<compile_context>
chip_gen: v7x
topology: tpu7x:2x2x1
jax: 0.10.0
libtpu: 0.0.40
codegen_flags: <defaults>
</compile_context>

<pallas_src>
import functools
import math

import jax
import jax.numpy as jnp
from jax.experimental import pallas as pl
from jax.experimental.pallas import tpu as pltpu

OUT_PAD = 128               # lane-dense padded width of intermediate/final slabs
_LN_EPS = 1e-5              # PyTorch nn.LayerNorm default
_GELU_C = math.sqrt(2.0 / math.pi)

_MOSAIC = pltpu.CompilerParams(
    dimension_semantics=("parallel",),
    vmem_limit_bytes=32 * 1024 * 1024,
)


# ----------------------------------------------------------------------------
# small helpers (usable inside kernels)
# ----------------------------------------------------------------------------

def _ln(v):
    mu = jnp.mean(v, axis=-1, keepdims=True)
    var = jnp.mean((v - mu) ** 2, axis=-1, keepdims=True)
    return (v - mu) * jax.lax.rsqrt(var + _LN_EPS)


def _gelu(v):
    # tanh-approximate GELU (EUP tanh instead of the erf VALU polynomial)
    return 0.5 * v * (1.0 + jnp.tanh(_GELU_C * (v + 0.044715 * v * v * v)))


def _round_up(x, m):
    return ((x + m - 1) // m) * m


def _row_tile(rows, max_tile=2048):
    rows = max(int(rows), 1)
    if rows >= 16:
        tile = _round_up(rows // 2, 8)   # >= 2 grid steps -> both v7x TCs busy
    else:
        tile = _round_up(rows, 8)
    return max(8, min(tile, max_tile))


def _pad_rows(a, rows_pad):
    pad = rows_pad - a.shape[0]
    return a if pad == 0 else jnp.pad(a, ((0, pad), (0, 0)))


# ----------------------------------------------------------------------------
# Kernel 1: last-timestep Mamba-encoder stand-in + mamba_norm + mamba_to_gps
#   packed vec rows: [enc_b, mn_g, mn_b, m2g_b1, g1, be1, m2g_b2, g2, be2]
#   output (lane-dense, 128 wide): [ last_norm (d_model) | gps_input (h) | 0 ]
# ----------------------------------------------------------------------------

def _encode_kernel(x_ref, ew_ref, vec_ref, w1_ref, w2_ref, o_ref):
    f32 = jnp.float32
    x = x_ref[...]
    v = vec_ref[...]
    # padding mask for the consumed timestep: |x|.sum(-1) > 0
    mask = (jnp.sum(jnp.abs(x), axis=-1, keepdims=True) > 0).astype(f32)
    enc = jnp.tanh(jnp.dot(x, ew_ref[...], preferred_element_type=f32)
                   + v[0:1, :]) * mask
    ln0 = _ln(enc) * v[1:2, :] + v[2:3, :]                         # mamba_norm
    y1 = jnp.dot(ln0, w1_ref[...], preferred_element_type=f32) + v[3:4, :]
    y1 = _gelu(_ln(y1) * v[4:5, :] + v[5:6, :])                    # Linear+LN+GELU
    y2 = jnp.dot(y1, w2_ref[...], preferred_element_type=f32) + v[6:7, :]
    y2 = _ln(y2) * v[7:8, :] + v[8:9, :]                           # Linear+LN
    zpad = jnp.zeros((ln0.shape[0], OUT_PAD - ln0.shape[1] - y2.shape[1]), f32)
    o_ref[...] = jnp.concatenate([ln0, y2, zpad], axis=-1)


def encode(x_last, p, *, max_tile=2048):
    rows, fdim = x_last.shape
    tile = _row_tile(rows, max_tile)
    rows_pad = _round_up(rows, tile)
    xp = _pad_rows(x_last, rows_pad)

    def full(arr):
        return pl.BlockSpec(arr.shape, lambda i: (0,) * arr.ndim)

    return pl.pallas_call(
        _encode_kernel,
        out_shape=jax.ShapeDtypeStruct((rows_pad, OUT_PAD), jnp.float32),
        grid=(rows_pad // tile,),
        in_specs=[
            pl.BlockSpec((tile, fdim), lambda i: (i, 0)),
            full(p["enc_w"]), full(p["k2_vec"]),
            full(p["m2g_w1"]), full(p["m2g_w2"]),
        ],
        out_specs=pl.BlockSpec((tile, OUT_PAD), lambda i: (i, 0)),
        compiler_params=_MOSAIC,
    )(xp, p["enc_w"], p["k2_vec"], p["m2g_w1"], p["m2g_w2"])


# ----------------------------------------------------------------------------
# Kernel 2: fully fused heads on the batch rows
#   - dense normalized-adjacency aggregation (graph mean message passing)
#   - GraphGPS-stand-in tail (Linear+GELU) + gps_norm
#   - flat_fc (Linear+LN+GELU)
#   - out_layer with lambda-weighted concat folded into row-block matmuls
#     (lambdas pre-folded into weights in XLA)
#   - mamba_out head with concat(last, flat_out) folded into row-block matmuls
#   - both 1-wide output projections merged into one 128-lane padded matmul
# ----------------------------------------------------------------------------

def _head_kernel(dims, pre_b_ref, pre_all_ref, a_ref, flat_ref,
                 gps_w_ref, flat_w_ref, ow_gps_ref, ow_ts_ref, ow_flat_ref,
                 mw_ts_ref, mw_flat_ref, wfin_a_ref, wfin_b_ref, vec_ref, o_ref):
    f32 = jnp.float32
    gps_out, flat_nhid, fc_half, ts_half = dims
    v = vec_ref[...]
    pre_b = pre_b_ref[...]                                   # [last_norm | gps_in | 0]

    # graph neighbor mean-aggregation folded into a dense matmul
    h_full = pre_b + jnp.dot(a_ref[...], pre_all_ref[...], preferred_element_type=f32)

    # GraphGPS-encoder stand-in tail (Linear + GELU), then gps_norm; gps_w is
    # zero-padded to 128 input rows so it also selects the gps_in columns.
    g = _gelu(jnp.dot(h_full, gps_w_ref[...], preferred_element_type=f32)
              + v[0:1, :gps_out])
    g = _ln(g) * v[1:2, :gps_out] + v[2:3, :gps_out]

    # flat_fc: Linear -> LayerNorm -> GELU
    fo = jnp.dot(flat_ref[...], flat_w_ref[...], preferred_element_type=f32) + v[3:4, :flat_nhid]
    fo = _gelu(_ln(fo) * v[4:5, :flat_nhid] + v[5:6, :flat_nhid])

    # out_layer first Linear; lambda scaling already folded into the weights,
    # ow_ts zero-padded to 128 rows so pre_b selects the last_norm columns.
    h1 = (jnp.dot(g, ow_gps_ref[...], preferred_element_type=f32)
          + jnp.dot(pre_b, ow_ts_ref[...], preferred_element_type=f32)
          + jnp.dot(fo, ow_flat_ref[...], preferred_element_type=f32)
          + v[6:7, :fc_half])
    h1 = _gelu(_ln(h1) * v[7:8, :fc_half] + v[8:9, :fc_half])   # Dropout = identity

    # mamba_out head first Linear (ts_in = concat(last, flat_out) folded in)
    h2 = (jnp.dot(pre_b, mw_ts_ref[...], preferred_element_type=f32)
          + jnp.dot(fo, mw_flat_ref[...], preferred_element_type=f32)
          + v[9:10, :ts_half])
    h2 = _gelu(_ln(h2) * v[10:11, :ts_half] + v[11:12, :ts_half])

    # merged, lane-dense final projections (col 0..out_dim-1 = y, next = mamba_y)
    o_ref[...] = (jnp.dot(h1, wfin_a_ref[...], preferred_element_type=f32)
                  + jnp.dot(h2, wfin_b_ref[...], preferred_element_type=f32)
                  + v[12:13, :])


def final_head(pre, a_norm, flat, p, dims, batch_size, *, max_tile=2048):
    tile = _row_tile(batch_size, max_tile)
    b_pad = _round_up(batch_size, tile)
    n_pre = pre.shape[0]
    if b_pad > n_pre:                       # batch padding exceeds node rows
        pre = _pad_rows(pre, b_pad)
        n_pre = b_pad
    if a_norm.shape[1] != n_pre:
        a_norm = jnp.pad(a_norm, ((0, 0), (0, n_pre - a_norm.shape[1])))
    a_in = _pad_rows(a_norm, b_pad)
    flat_in = flat if flat.shape[0] >= b_pad else _pad_rows(flat, b_pad)
    flat_dim = flat_in.shape[1]

    def full(arr):
        return pl.BlockSpec(arr.shape, lambda i: (0,) * arr.ndim)

    kernel = functools.partial(_head_kernel, dims)
    out = pl.pallas_call(
        kernel,
        out_shape=jax.ShapeDtypeStruct((b_pad, OUT_PAD), jnp.float32),
        grid=(b_pad // tile,),
        in_specs=[
            pl.BlockSpec((tile, OUT_PAD), lambda i: (i, 0)),     # pre: batch rows
            pl.BlockSpec((n_pre, OUT_PAD), lambda i: (0, 0)),    # pre: resident full
            pl.BlockSpec((tile, n_pre), lambda i: (i, 0)),       # normalized adjacency
            pl.BlockSpec((tile, flat_dim), lambda i: (i, 0)),    # flat features
            full(p["gps_w_pad"]), full(p["flat_w"]),
            full(p["ow_gps_s"]), full(p["ow_ts_s"]), full(p["ow_flat_s"]),
            full(p["mw_ts_pad"]), full(p["mw_flat"]),
            full(p["wfin_a"]), full(p["wfin_b"]), full(p["k3_vec"]),
        ],
        out_specs=pl.BlockSpec((tile, OUT_PAD), lambda i: (i, 0)),
        compiler_params=_MOSAIC,
    )(pre, pre, a_in, flat_in,
      p["gps_w_pad"], p["flat_w"],
      p["ow_gps_s"], p["ow_ts_s"], p["ow_flat_s"],
      p["mw_ts_pad"], p["mw_flat"],
      p["wfin_a"], p["wfin_b"], p["k3_vec"])
    return out if b_pad == batch_size else out[:batch_size]


# ----------------------------------------------------------------------------
# Deterministic parameter construction (mirrors _initialize_weights)
# ----------------------------------------------------------------------------

def build_params(cfg, seed=0):
    d_model = cfg["mamba_d_model"]
    h = cfg["gps_hidden_dim"]
    assert d_model == h, "5-layer mamba_to_gps variant (d_model == gps_hidden)"
    # TODO(synk): 3-layer mamba_to_gps variant (d_model != gps_hidden) not implemented.
    gps_out = cfg["gps_out_dim"]
    out_dim = cfg["out_dim"]
    flat_dim = cfg["flat_dim"]
    flat_nhid = cfg["flat_nhid"]
    fdim = cfg["seq_feat_dim"]
    fc_in = gps_out + d_model + flat_nhid
    fc_half = fc_in // 2
    ts_in = d_model + flat_nhid
    ts_half = ts_in // 2
    assert d_model + h <= OUT_PAD and 2 * out_dim <= OUT_PAD
    assert max(gps_out, flat_nhid, fc_half, ts_half) <= OUT_PAD

    keys = jax.random.split(jax.random.PRNGKey(seed), 9)

    def kaiming(key, din, dout):
        # kaiming_normal_(a=0.2, leaky_relu), fan_in = in_features
        gain = math.sqrt(2.0 / (1.0 + 0.2 ** 2))
        std = gain / math.sqrt(din)
        return jax.random.normal(key, (din, dout), jnp.float32) * std

    ones = lambda d: jnp.ones((d,), jnp.float32)
    zeros = lambda d: jnp.zeros((d,), jnp.float32)
    bias = lambda d: jnp.full((d,), 0.01, jnp.float32)

    p = {}
    # stand-in Mamba encoder projection (last timestep only is consumed)
    p["enc_w"] = kaiming(keys[0], fdim, d_model)
    # packed vectors for kernel 1: [enc_b, mn_g, mn_b, b1, g1, be1, b2, g2, be2]
    k2 = jnp.stack([bias(h), ones(h), zeros(h),
                    bias(h), ones(h), zeros(h),
                    bias(h), ones(h), zeros(h)])
    p["k2_vec"] = jnp.zeros((16, h), jnp.float32).at[:9].set(k2)
    p["m2g_w1"] = kaiming(keys[1], d_model, h)
    p["m2g_w2"] = kaiming(keys[2], h, h)

    # GraphGPS stand-in output projection, zero-padded to 128 input rows so the
    # 128-lane [last_norm | gps_in | 0] slab selects the gps_in columns via MXU.
    gps_w = kaiming(keys[3], h, gps_out)
    p["gps_w_pad"] = jnp.zeros((OUT_PAD, gps_out), jnp.float32).at[
        d_model:d_model + h].set(gps_w)

    # flat_fc
    p["flat_w"] = kaiming(keys[4], flat_dim, flat_nhid)

    # out_layer first Linear split into [gps | ts | flat] row blocks
    out_w1 = kaiming(keys[5], fc_in, fc_half)
    p["ow_gps"] = out_w1[:gps_out]
    p["ow_ts_pad"] = jnp.zeros((OUT_PAD, fc_half), jnp.float32).at[:d_model].set(
        out_w1[gps_out:gps_out + d_model])
    p["ow_flat"] = out_w1[gps_out + d_model:]

    # mamba_out head first Linear split into [ts | flat] row blocks
    mo_w1 = kaiming(keys[6], ts_in, ts_half)
    p["mw_ts_pad"] = jnp.zeros((OUT_PAD, ts_half), jnp.float32).at[:d_model].set(
        mo_w1[:d_model])
    p["mw_flat"] = mo_w1[d_model:]

    # merged, lane-padded final heads (cols [0:out_dim]=y, [out_dim:2out_dim]=mamba_y)
    out_w2 = kaiming(keys[7], fc_half, out_dim)
    mo_w2 = kaiming(keys[8], ts_half, out_dim)
    p["wfin_a"] = jnp.zeros((fc_half, OUT_PAD), jnp.float32).at[:, :out_dim].set(out_w2)
    p["wfin_b"] = jnp.zeros((ts_half, OUT_PAD), jnp.float32).at[:, out_dim:2 * out_dim].set(mo_w2)

    # packed bias / LayerNorm vectors for kernel 2 (one 16x128 slab)
    k3 = jnp.zeros((16, OUT_PAD), jnp.float32)
    k3 = k3.at[0, :gps_out].set(bias(gps_out))       # gps Linear bias
    k3 = k3.at[1, :gps_out].set(ones(gps_out))       # gps_norm gamma (beta row 2 = 0)
    k3 = k3.at[3, :flat_nhid].set(bias(flat_nhid))   # flat_fc bias
    k3 = k3.at[4, :flat_nhid].set(ones(flat_nhid))   # flat LN gamma
    k3 = k3.at[6, :fc_half].set(bias(fc_half))       # out_layer L1 bias
    k3 = k3.at[7, :fc_half].set(ones(fc_half))       # out_layer LN gamma
    k3 = k3.at[9, :ts_half].set(bias(ts_half))       # mamba_out L1 bias
    k3 = k3.at[10, :ts_half].set(ones(ts_half))      # mamba_out LN gamma
    k3 = k3.at[12, :2 * out_dim].set(0.01)           # merged final head biases
    p["k3_vec"] = k3

    # branch mixing lambdas (nn.Parameter(torch.ones(1)))
    p["lambda_gps"] = jnp.ones((1,), jnp.float32)
    p["lambda_ts"] = jnp.ones((1,), jnp.float32)
    p["lambda_flat"] = jnp.ones((1,), jnp.float32)
    return p


# ----------------------------------------------------------------------------
# Forward pass (inference: Dropout = identity, last_act = Identity)
# ----------------------------------------------------------------------------

def mamba_graph_gps_forward(params, x, flat, adjs, batch_size, cfg):
    p = params
    N = x.shape[0]
    d_model = cfg["mamba_d_model"]
    gps_out = cfg["gps_out_dim"]
    flat_nhid = cfg["flat_nhid"]
    out_dim = cfg["out_dim"]
    fc_half = (gps_out + d_model + flat_nhid) // 2
    ts_half = (d_model + flat_nhid) // 2
    dims = (gps_out, flat_nhid, fc_half, ts_half)

    # --- Pallas K1: last-timestep encoder projection + mamba_norm + mamba_to_gps
    # TODO(synk): real Mamba SSM recurrence is an external, undefined module.
    pre = encode(x[:, -1, :], p)           # (N_pad, 128) = [last_norm | gps_in | 0]

    # --- dense normalized adjacency for batch rows (built once in XLA; the
    #     (B,N)@(N,128) aggregation matmul happens inside Pallas K2)
    # TODO(synk): real GraphGPS encoder is an external, undefined module.
    edge_index = adjs[0][0]
    src, dst = edge_index[0], edge_index[1]
    deg = jnp.zeros((N,), jnp.float32).at[dst].add(1.0)
    inv_deg = 1.0 / jnp.maximum(deg, 1.0)
    w = jnp.where(dst < batch_size, inv_deg[dst], 0.0)
    dst_c = jnp.minimum(dst, batch_size - 1)
    a_norm = jnp.zeros((batch_size, N), jnp.float32).at[dst_c, src].add(w)

    # --- softmaxed branch lambdas folded into the out_layer weight row blocks
    lam = jax.nn.softmax(
        jnp.concatenate([p["lambda_gps"], p["lambda_ts"], p["lambda_flat"]]))
    run = dict(p)
    run["ow_gps_s"] = lam[0] * p["ow_gps"]
    run["ow_ts_s"] = lam[1] * p["ow_ts_pad"]
    run["ow_flat_s"] = lam[2] * p["ow_flat"]

    # --- Pallas K2: aggregation + all remaining heads fused on the batch rows
    out = final_head(pre, a_norm, flat, run, dims, batch_size)
    y = out[:, :out_dim]
    mamba_y = out[:, out_dim:2 * out_dim]
    return y, mamba_y       # last_act = Identity (final_act_fn != 'hardtanh')


# ----------------------------------------------------------------------------
# Pure-JAX reference of the same forward (for the correctness check)
# ----------------------------------------------------------------------------

def _ref_forward(p, x, flat, edge_index, batch_size, cfg):
    d_model = cfg["mamba_d_model"]
    h = cfg["gps_hidden_dim"]
    gps_out = cfg["gps_out_dim"]
    flat_nhid = cfg["flat_nhid"]
    out_dim = cfg["out_dim"]
    fc_half = (gps_out + d_model + flat_nhid) // 2
    ts_half = (d_model + flat_nhid) // 2
    N = x.shape[0]
    B = batch_size

    v2 = p["k2_vec"]
    x_last = x[:, -1, :]
    mask = (jnp.abs(x_last).sum(-1, keepdims=True) > 0).astype(jnp.float32)
    enc = jnp.tanh(x_last @ p["enc_w"] + v2[0, :d_model]) * mask
    last_n = _ln(enc) * v2[1, :d_model] + v2[2, :d_model]
    y1 = _gelu(_ln(last_n @ p["m2g_w1"] + v2[3, :h]) * v2[4, :h] + v2[5, :h])
    gps_in = _ln(y1 @ p["m2g_w2"] + v2[6, :h]) * v2[7, :h] + v2[8, :h]

    src, dst = edge_index[0], edge_index[1]
    agg = jnp.zeros_like(gps_in).at[dst].add(gps_in[src])
    deg = jnp.zeros((N,), jnp.float32).at[dst].add(1.0)
    h_agg = gps_in + agg / jnp.maximum(deg, 1.0)[:, None]

    v3 = p["k3_vec"]
    gps_w = p["gps_w_pad"][d_model:d_model + h]
    g = _gelu(h_agg[:B] @ gps_w + v3[0, :gps_out])
    g = _ln(g) * v3[1, :gps_out] + v3[2, :gps_out]
    fo = flat[:B] @ p["flat_w"] + v3[3, :flat_nhid]
    fo = _gelu(_ln(fo) * v3[4, :flat_nhid] + v3[5, :flat_nhid])

    lam = jax.nn.softmax(
        jnp.concatenate([p["lambda_gps"], p["lambda_ts"], p["lambda_flat"]]))
    last_b = last_n[:B]
    ow_ts = p["ow_ts_pad"][:d_model]
    h1 = (lam[0] * g @ p["ow_gps"] + lam[1] * last_b @ ow_ts
          + lam[2] * fo @ p["ow_flat"] + v3[6, :fc_half])
    h1 = _gelu(_ln(h1) * v3[7, :fc_half] + v3[8, :fc_half])
    y = h1 @ p["wfin_a"][:, :out_dim] + 0.01

    mw_ts = p["mw_ts_pad"][:d_model]
    h2 = last_b @ mw_ts + fo @ p["mw_flat"] + v3[9, :ts_half]
    h2 = _gelu(_ln(h2) * v3[10, :ts_half] + v3[11, :ts_half])
    mamba_y = h2 @ p["wfin_b"][:, out_dim:2 * out_dim] + 0.01
    return y, mamba_y


# ----------------------------------------------------------------------------
# Example run
# ----------------------------------------------------------------------------

if __name__ == "__main__":
    cfg = dict(
        mamba_d_model=32,
        gps_hidden_dim=32,
        gps_out_dim=32,
        out_dim=1,
        flat_dim=12,
        flat_nhid=16,
        seq_feat_dim=10,
    )
    N, L, F = 128, 8, cfg["seq_feat_dim"]
    batch_size = 32

    key = jax.random.PRNGKey(0)
    kx, kf = jax.random.split(key)
    x = jax.random.normal(kx, (N, L, F), jnp.float32)
    # zero the last timestep of some sequences to exercise the padding-mask path
    x = x.at[: N // 4, -1, :].set(0.0)
    flat = jax.random.normal(kf, (N, cfg["flat_dim"]), jnp.float32)

    # simple bidirectional ring graph
    idx = jnp.arange(N, dtype=jnp.int32)
    src = jnp.concatenate([idx, (idx + 1) % N])
    dst = jnp.concatenate([(idx + 1) % N, idx])
    edge_index = jnp.stack([src, dst], axis=0)
    adjs = [(edge_index, None, None)]

    params = build_params(cfg)

    fwd = jax.jit(
        lambda pp, xx, ff: mamba_graph_gps_forward(pp, xx, ff, adjs, batch_size, cfg))
    y, mamba_y = fwd(params, x, flat)
    jax.block_until_ready((y, mamba_y))

    assert y.shape == (batch_size, cfg["out_dim"])
    assert mamba_y.shape == (batch_size, cfg["out_dim"])
    assert bool(jnp.all(jnp.isfinite(y))) and bool(jnp.all(jnp.isfinite(mamba_y)))

    # numerical check against a pure-JAX reference of the same forward.
    # (Both paths use default MXU matmul precision -> tolerance re-baselined
    #  vs. the previous 'highest'-precision check.)
    y_ref, my_ref = _ref_forward(params, x, flat, edge_index, batch_size, cfg)
    assert jnp.allclose(y, y_ref, atol=5e-2, rtol=5e-2), \
        float(jnp.max(jnp.abs(y - y_ref)))
    assert jnp.allclose(mamba_y, my_ref, atol=5e-2, rtol=5e-2), \
        float(jnp.max(jnp.abs(mamba_y - my_ref)))

    print("KERNEL_OK")
</pallas_src>

<mosaic_0001>
module attributes {stable_mosaic.version = 11 : i64} {
  func.func @_encode_kernel(%arg0: i32, %arg1: memref<64x10xf32, #tpu.memory_space<vmem>>, %arg2: memref<10x32xf32, #tpu.memory_space<vmem>>, %arg3: memref<16x32xf32, #tpu.memory_space<vmem>>, %arg4: memref<32x32xf32, #tpu.memory_space<vmem>>, %arg5: memref<32x32xf32, #tpu.memory_space<vmem>>, %arg6: memref<64x128xf32, #tpu.memory_space<vmem>>) attributes {dimension_semantics = [#tpu.dimension_semantics<parallel>], iteration_bounds = array<i64: 2>, scalar_prefetch = 0 : i64, scratch_operands = 0 : i64, tpu.core_type = #tpu.core_type<tc>, window_params = [{transform_indices = @transform_0, window_bounds = array<i64: 64, 10>}, {pipeline_mode = #tpu.pipeline_mode<synchronous>, transform_indices = @transform_1, window_bounds = array<i64: 10, 32>}, {pipeline_mode = #tpu.pipeline_mode<synchronous>, transform_indices = @transform_2, window_bounds = array<i64: 16, 32>}, {pipeline_mode = #tpu.pipeline_mode<synchronous>, transform_indices = @transform_3, window_bounds = array<i64: 32, 32>}, {pipeline_mode = #tpu.pipeline_mode<synchronous>, transform_indices = @transform_4, window_bounds = array<i64: 32, 32>}, {transform_indices = @transform_5, window_bounds = array<i64: 64, 128>}]} {
    %c0 = arith.constant 0 : index
    %c0_0 = arith.constant 0 : index
    %0 = vector.load %arg1[%c0, %c0_0] : memref<64x10xf32, #tpu.memory_space<vmem>>, vector<64x10xf32>
    %c0_1 = arith.constant 0 : index
    %c0_2 = arith.constant 0 : index
    %1 = vector.load %arg3[%c0_1, %c0_2] : memref<16x32xf32, #tpu.memory_space<vmem>>, vector<16x32xf32>
    %2 = math.absf %0 : vector<64x10xf32>
    %cst = arith.constant dense<0.000000e+00> : vector<64xf32>
    %3 = vector.multi_reduction <add>, %2, %cst [1] : vector<64x10xf32> to vector<64xf32>
    %4 = vector.shape_cast %3 : vector<64xf32> to vector<64x1xf32>
    %cst_3 = arith.constant 0.000000e+00 : f32
    %5 = vector.broadcast %cst_3 : f32 to vector<64x1xf32>
    %6 = arith.cmpf ogt, %4, %5 : vector<64x1xf32>
    %7 = arith.extui %6 : vector<64x1xi1> to vector<64x1xi32>
    %8 = arith.sitofp %7 : vector<64x1xi32> to vector<64x1xf32>
    %c0_4 = arith.constant 0 : index
    %c0_5 = arith.constant 0 : index
    %9 = vector.load %arg2[%c0_4, %c0_5] : memref<10x32xf32, #tpu.memory_space<vmem>>, vector<10x32xf32>
    %cst_6 = arith.constant dense<0.000000e+00> : vector<64x32xf32>
    %10 = tpu.matmul %0, %9, %cst_6 {dimension_numbers = #tpu.dot_dimension_numbers<[1], [0], [0], [1], [0, 0, 1, 1], [], []>} : vector<64x10xf32>, vector<10x32xf32>, vector<64x32xf32> -> vector<64x32xf32>
    %11 = vector.extract_strided_slice %1 {offsets = [0, 0], sizes = [1, 32], strides = [1, 1]} : vector<16x32xf32> to vector<1x32xf32>
    %12 = vector.broadcast %11 : vector<1x32xf32> to vector<64x32xf32>
    %13 = arith.addf %10, %12 : vector<64x32xf32>
    %14 = math.tanh %13 : vector<64x32xf32>
    %15 = vector.broadcast %8 : vector<64x1xf32> to vector<64x32xf32>
    %16 = arith.mulf %14, %15 : vector<64x32xf32>
    %cst_7 = arith.constant dense<0.000000e+00> : vector<64xf32>
    %17 = vector.multi_reduction <add>, %16, %cst_7 [1] : vector<64x32xf32> to vector<64xf32>
    %18 = vector.shape_cast %17 : vector<64xf32> to vector<64x1xf32>
    %cst_8 = arith.constant 3.200000e+01 : f32
    %19 = vector.broadcast %cst_8 : f32 to vector<64x1xf32>
    %20 = arith.divf %18, %19 : vector<64x1xf32>
    %21 = vector.broadcast %20 : vector<64x1xf32> to vector<64x32xf32>
    %22 = arith.subf %16, %21 : vector<64x32xf32>
    %23 = arith.mulf %22, %22 : vector<64x32xf32>
    %cst_9 = arith.constant dense<0.000000e+00> : vector<64xf32>
    %24 = vector.multi_reduction <add>, %23, %cst_9 [1] : vector<64x32xf32> to vector<64xf32>
    %25 = vector.shape_cast %24 : vector<64xf32> to vector<64x1xf32>
    %cst_10 = arith.constant 3.200000e+01 : f32
    %26 = vector.broadcast %cst_10 : f32 to vector<64x1xf32>
    %27 = arith.divf %25, %26 : vector<64x1xf32>
    %28 = vector.broadcast %20 : vector<64x1xf32> to vector<64x32xf32>
    %29 = arith.subf %16, %28 : vector<64x32xf32>
    %cst_11 = arith.constant 9.99999974E-6 : f32
    %30 = vector.broadcast %cst_11 : f32 to vector<64x1xf32>
    %31 = arith.addf %27, %30 : vector<64x1xf32>
    %32 = math.rsqrt %31 : vector<64x1xf32>
    %33 = vector.broadcast %32 : vector<64x1xf32> to vector<64x32xf32>
    %34 = arith.mulf %29, %33 : vector<64x32xf32>
    %35 = vector.extract_strided_slice %1 {offsets = [1, 0], sizes = [1, 32], strides = [1, 1]} : vector<16x32xf32> to vector<1x32xf32>
    %36 = vector.broadcast %35 : vector<1x32xf32> to vector<64x32xf32>
    %37 = arith.mulf %34, %36 : vector<64x32xf32>
    %38 = vector.extract_strided_slice %1 {offsets = [2, 0], sizes = [1, 32], strides = [1, 1]} : vector<16x32xf32> to vector<1x32xf32>
    %39 = vector.broadcast %38 : vector<1x32xf32> to vector<64x32xf32>
    %40 = arith.addf %37, %39 : vector<64x32xf32>
    %c0_12 = arith.constant 0 : index
    %c0_13 = arith.constant 0 : index
    %41 = vector.load %arg4[%c0_12, %c0_13] : memref<32x32xf32, #tpu.memory_space<vmem>>, vector<32x32xf32>
    %cst_14 = arith.constant dense<0.000000e+00> : vector<64x32xf32>
    %42 = tpu.matmul %40, %41, %cst_14 {dimension_numbers = #tpu.dot_dimension_numbers<[1], [0], [0], [1], [0, 0, 1, 1], [], []>} : vector<64x32xf32>, vector<32x32xf32>, vector<64x32xf32> -> vector<64x32xf32>
    %43 = vector.extract_strided_slice %1 {offsets = [3, 0], sizes = [1, 32], strides = [1, 1]} : vector<16x32xf32> to vector<1x32xf32>
    %44 = vector.broadcast %43 : vector<1x32xf32> to vector<64x32xf32>
    %45 = arith.addf %42, %44 : vector<64x32xf32>
    %cst_15 = arith.constant dense<0.000000e+00> : vector<64xf32>
    %46 = vector.multi_reduction <add>, %45, %cst_15 [1] : vector<64x32xf32> to vector<64xf32>
    %47 = vector.shape_cast %46 : vector<64xf32> to vector<64x1xf32>
    %cst_16 = arith.constant 3.200000e+01 : f32
    %48 = vector.broadcast %cst_16 : f32 to vector<64x1xf32>
    %49 = arith.divf %47, %48 : vector<64x1xf32>
    %50 = vector.broadcast %49 : vector<64x1xf32> to vector<64x32xf32>
    %51 = arith.subf %45, %50 : vector<64x32xf32>
    %52 = arith.mulf %51, %51 : vector<64x32xf32>
    %cst_17 = arith.constant dense<0.000000e+00> : vector<64xf32>
    %53 = vector.multi_reduction <add>, %52, %cst_17 [1] : vector<64x32xf32> to vector<64xf32>
    %54 = vector.shape_cast %53 : vector<64xf32> to vector<64x1xf32>
    %cst_18 = arith.constant 3.200000e+01 : f32
    %55 = vector.broadcast %cst_18 : f32 to vector<64x1xf32>
    %56 = arith.divf %54, %55 : vector<64x1xf32>
    %57 = vector.broadcast %49 : vector<64x1xf32> to vector<64x32xf32>
    %58 = arith.subf %45, %57 : vector<64x32xf32>
    %cst_19 = arith.constant 9.99999974E-6 : f32
    %59 = vector.broadcast %cst_19 : f32 to vector<64x1xf32>
    %60 = arith.addf %56, %59 : vector<64x1xf32>
    %61 = math.rsqrt %60 : vector<64x1xf32>
    %62 = vector.broadcast %61 : vector<64x1xf32> to vector<64x32xf32>
    %63 = arith.mulf %58, %62 : vector<64x32xf32>
    %64 = vector.extract_strided_slice %1 {offsets = [4, 0], sizes = [1, 32], strides = [1, 1]} : vector<16x32xf32> to vector<1x32xf32>
    %65 = vector.broadcast %64 : vector<1x32xf32> to vector<64x32xf32>
    %66 = arith.mulf %63, %65 : vector<64x32xf32>
    %67 = vector.extract_strided_slice %1 {offsets = [5, 0], sizes = [1, 32], strides = [1, 1]} : vector<16x32xf32> to vector<1x32xf32>
    %68 = vector.broadcast %67 : vector<1x32xf32> to vector<64x32xf32>
    %69 = arith.addf %66, %68 : vector<64x32xf32>
    %cst_20 = arith.constant 5.000000e-01 : f32
    %70 = vector.broadcast %cst_20 : f32 to vector<64x32xf32>
    %71 = arith.mulf %70, %69 : vector<64x32xf32>
    %cst_21 = arith.constant 4.471500e-02 : f32
    %72 = vector.broadcast %cst_21 : f32 to vector<64x32xf32>
    %73 = arith.mulf %72, %69 : vector<64x32xf32>
    %74 = arith.mulf %73, %69 : vector<64x32xf32>
    %75 = arith.mulf %74, %69 : vector<64x32xf32>
    %76 = arith.addf %69, %75 : vector<64x32xf32>
    %cst_22 = arith.constant 0.797884583 : f32
    %77 = vector.broadcast %cst_22 : f32 to vector<64x32xf32>
    %78 = arith.mulf %77, %76 : vector<64x32xf32>
    %79 = math.tanh %78 : vector<64x32xf32>
    %cst_23 = arith.constant 1.000000e+00 : f32
    %80 = vector.broadcast %cst_23 : f32 to vector<64x32xf32>
    %81 = arith.addf %80, %79 : vector<64x32xf32>
    %82 = arith.mulf %71, %81 : vector<64x32xf32>
    %c0_24 = arith.constant 0 : index
    %c0_25 = arith.constant 0 : index
    %83 = vector.load %arg5[%c0_24, %c0_25] : memref<32x32xf32, #tpu.memory_space<vmem>>, vector<32x32xf32>
    %cst_26 = arith.constant dense<0.000000e+00> : vector<64x32xf32>
    %84 = tpu.matmul %82, %83, %cst_26 {dimension_numbers = #tpu.dot_dimension_numbers<[1], [0], [0], [1], [0, 0, 1, 1], [], []>} : vector<64x32xf32>, vector<32x32xf32>, vector<64x32xf32> -> vector<64x32xf32>
    %85 = vector.extract_strided_slice %1 {offsets = [6, 0], sizes = [1, 32], strides = [1, 1]} : vector<16x32xf32> to vector<1x32xf32>
    %86 = vector.broadcast %85 : vector<1x32xf32> to vector<64x32xf32>
    %87 = arith.addf %84, %86 : vector<64x32xf32>
    %cst_27 = arith.constant dense<0.000000e+00> : vector<64xf32>
    %88 = vector.multi_reduction <add>, %87, %cst_27 [1] : vector<64x32xf32> to vector<64xf32>
    %89 = vector.shape_cast %88 : vector<64xf32> to vector<64x1xf32>
    %cst_28 = arith.constant 3.200000e+01 : f32
    %90 = vector.broadcast %cst_28 : f32 to vector<64x1xf32>
    %91 = arith.divf %89, %90 : vector<64x1xf32>
    %92 = vector.broadcast %91 : vector<64x1xf32> to vector<64x32xf32>
    %93 = arith.subf %87, %92 : vector<64x32xf32>
    %94 = arith.mulf %93, %93 : vector<64x32xf32>
    %cst_29 = arith.constant dense<0.000000e+00> : vector<64xf32>
    %95 = vector.multi_reduction <add>, %94, %cst_29 [1] : vector<64x32xf32> to vector<64xf32>
    %96 = vector.shape_cast %95 : vector<64xf32> to vector<64x1xf32>
    %cst_30 = arith.constant 3.200000e+01 : f32
    %97 = vector.broadcast %cst_30 : f32 to vector<64x1xf32>
    %98 = arith.divf %96, %97 : vector<64x1xf32>
    %99 = vector.broadcast %91 : vector<64x1xf32> to vector<64x32xf32>
    %100 = arith.subf %87, %99 : vector<64x32xf32>
    %cst_31 = arith.constant 9.99999974E-6 : f32
    %101 = vector.broadcast %cst_31 : f32 to vector<64x1xf32>
    %102 = arith.addf %98, %101 : vector<64x1xf32>
    %103 = math.rsqrt %102 : vector<64x1xf32>
    %104 = vector.broadcast %103 : vector<64x1xf32> to vector<64x32xf32>
    %105 = arith.mulf %100, %104 : vector<64x32xf32>
    %106 = vector.extract_strided_slice %1 {offsets = [7, 0], sizes = [1, 32], strides = [1, 1]} : vector<16x32xf32> to vector<1x32xf32>
    %107 = vector.broadcast %106 : vector<1x32xf32> to vector<64x32xf32>
    %108 = arith.mulf %105, %107 : vector<64x32xf32>
    %109 = vector.extract_strided_slice %1 {offsets = [8, 0], sizes = [1, 32], strides = [1, 1]} : vector<16x32xf32> to vector<1x32xf32>
    %110 = vector.broadcast %109 : vector<1x32xf32> to vector<64x32xf32>
    %111 = arith.addf %108, %110 : vector<64x32xf32>
    %cst_32 = arith.constant 0.000000e+00 : f32
    %112 = vector.broadcast %cst_32 : f32 to vector<64x64xf32>
    %113 = tpu.concatenate %40, %111, %112 in 1 : vector<64x32xf32>, vector<64x32xf32>, vector<64x64xf32> -> vector<64x128xf32>
    %c0_33 = arith.constant 0 : index
    %c0_34 = arith.constant 0 : index
    %114 = vector.load %arg6[%c0_33, %c0_34] : memref<64x128xf32, #tpu.memory_space<vmem>>, vector<64x128xf32>
    tpu.vector_store %arg6[%c0_33, %c0_34], %113 {strides = array<i32>} : memref<64x128xf32, #tpu.memory_space<vmem>>, vector<64x128xf32>,
    return
  }
  func.func @transform_0(%arg0: i32) -> (i32, i32) {
    %c0_i32 = arith.constant 0 : i32
    %c0_i32_0 = arith.constant 0 : i32
    return %arg0, %c0_i32 : i32, i32
  }
  func.func @transform_1(%arg0: i32) -> (i32, i32) {
    %c0_i32 = arith.constant 0 : i32
    %c0_i32_0 = arith.constant 0 : i32
    %c0_i32_1 = arith.constant 0 : i32
    return %c0_i32, %c0_i32_0 : i32, i32
  }
  func.func @transform_2(%arg0: i32) -> (i32, i32) {
    %c0_i32 = arith.constant 0 : i32
    %c0_i32_0 = arith.constant 0 : i32
    %c0_i32_1 = arith.constant 0 : i32
    return %c0_i32, %c0_i32_0 : i32, i32
  }
  func.func @transform_3(%arg0: i32) -> (i32, i32) {
    %c0_i32 = arith.constant 0 : i32
    %c0_i32_0 = arith.constant 0 : i32
    %c0_i32_1 = arith.constant 0 : i32
    return %c0_i32, %c0_i32_0 : i32, i32
  }
  func.func @transform_4(%arg0: i32) -> (i32, i32) {
    %c0_i32 = arith.constant 0 : i32
    %c0_i32_0 = arith.constant 0 : i32
    %c0_i32_1 = arith.constant 0 : i32
    return %c0_i32, %c0_i32_0 : i32, i32
  }
  func.func @transform_5(%arg0: i32) -> (i32, i32) {
    %c0_i32 = arith.constant 0 : i32
    %c0_i32_0 = arith.constant 0 : i32
    return %arg0, %c0_i32 : i32, i32
  }
}

module attributes {stable_mosaic.version = 11 : i64} {
  func.func @_head_kernel(%arg0: i32, %arg1: memref<16x128xf32, #tpu.memory_space<vmem>>, %arg2: memref<128x128xf32, #tpu.memory_space<vmem>>, %arg3: memref<16x128xf32, #tpu.memory_space<vmem>>, %arg4: memref<16x12xf32, #tpu.memory_space<vmem>>, %arg5: memref<128x32xf32, #tpu.memory_space<vmem>>, %arg6: memref<12x16xf32, #tpu.memory_space<vmem>>, %arg7: memref<32x40xf32, #tpu.memory_space<vmem>>, %arg8: memref<128x40xf32, #tpu.memory_space<vmem>>, %arg9: memref<16x40xf32, #tpu.memory_space<vmem>>, %arg10: memref<128x24xf32, #tpu.memory_space<vmem>>, %arg11: memref<16x24xf32, #tpu.memory_space<vmem>>, %arg12: memref<40x128xf32, #tpu.memory_space<vmem>>, %arg13: memref<24x128xf32, #tpu.memory_space<vmem>>, %arg14: memref<16x128xf32, #tpu.memory_space<vmem>>, %arg15: memref<16x128xf32, #tpu.memory_space<vmem>>) attributes {dimension_semantics = [#tpu.dimension_semantics<parallel>], iteration_bounds = array<i64: 2>, scalar_prefetch = 0 : i64, scratch_operands = 0 : i64, tpu.core_type = #tpu.core_type<tc>, window_params = [{transform_indices = @transform_0, window_bounds = array<i64: 16, 128>}, {pipeline_mode = #tpu.pipeline_mode<synchronous>, transform_indices = @transform_1, window_bounds = array<i64: 128, 128>}, {transform_indices = @transform_2, window_bounds = array<i64: 16, 128>}, {transform_indices = @transform_3, window_bounds = array<i64: 16, 12>}, {pipeline_mode = #tpu.pipeline_mode<synchronous>, transform_indices = @transform_4, window_bounds = array<i64: 128, 32>}, {pipeline_mode = #tpu.pipeline_mode<synchronous>, transform_indices = @transform_5, window_bounds = array<i64: 12, 16>}, {pipeline_mode = #tpu.pipeline_mode<synchronous>, transform_indices = @transform_6, window_bounds = array<i64: 32, 40>}, {pipeline_mode = #tpu.pipeline_mode<synchronous>, transform_indices = @transform_7, window_bounds = array<i64: 128, 40>}, {pipeline_mode = #tpu.pipeline_mode<synchronous>, transform_indices = @transform_8, window_bounds = array<i64: 16, 40>}, {pipeline_mode = #tpu.pipeline_mode<synchronous>, transform_indices = @transform_9, window_bounds = array<i64: 128, 24>}, {pipeline_mode = #tpu.pipeline_mode<synchronous>, transform_indices = @transform_10, window_bounds = array<i64: 16, 24>}, {pipeline_mode = #tpu.pipeline_mode<synchronous>, transform_indices = @transform_11, window_bounds = array<i64: 40, 128>}, {pipeline_mode = #tpu.pipeline_mode<synchronous>, transform_indices = @transform_12, window_bounds = array<i64: 24, 128>}, {pipeline_mode = #tpu.pipeline_mode<synchronous>, transform_indices = @transform_13, window_bounds = array<i64: 16, 128>}, {transform_indices = @transform_14, window_bounds = array<i64: 16, 128>}]} {
    %c0 = arith.constant 0 : index
    %c0_0 = arith.constant 0 : index
    %0 = vector.load %arg14[%c0, %c0_0] : memref<16x128xf32, #tpu.memory_space<vmem>>, vector<16x128xf32>
    %c0_1 = arith.constant 0 : index
    %c0_2 = arith.constant 0 : index
    %1 = vector.load %arg1[%c0_1, %c0_2] : memref<16x128xf32, #tpu.memory_space<vmem>>, vector<16x128xf32>
    %c0_3 = arith.constant 0 : index
    %c0_4 = arith.constant 0 : index
    %2 = vector.load %arg3[%c0_3, %c0_4] : memref<16x128xf32, #tpu.memory_space<vmem>>, vector<16x128xf32>
    %c0_5 = arith.constant 0 : index
    %c0_6 = arith.constant 0 : index
    %3 = vector.load %arg2[%c0_5, %c0_6] : memref<128x128xf32, #tpu.memory_space<vmem>>, vector<128x128xf32>
    %cst = arith.constant dense<0.000000e+00> : vector<16x128xf32>
    %4 = tpu.matmul %2, %3, %cst {dimension_numbers = #tpu.dot_dimension_numbers<[1], [0], [0], [1], [0, 0, 1, 1], [], []>} : vector<16x128xf32>, vector<128x128xf32>, vector<16x128xf32> -> vector<16x128xf32>
    %5 = arith.addf %1, %4 : vector<16x128xf32>
    %c0_7 = arith.constant 0 : index
    %c0_8 = arith.constant 0 : index
    %6 = vector.load %arg5[%c0_7, %c0_8] : memref<128x32xf32, #tpu.memory_space<vmem>>, vector<128x32xf32>
    %cst_9 = arith.constant dense<0.000000e+00> : vector<16x32xf32>
    %7 = tpu.matmul %5, %6, %cst_9 {dimension_numbers = #tpu.dot_dimension_numbers<[1], [0], [0], [1], [0, 0, 1, 1], [], []>} : vector<16x128xf32>, vector<128x32xf32>, vector<16x32xf32> -> vector<16x32xf32>
    %8 = vector.extract_strided_slice %0 {offsets = [0, 0], sizes = [1, 32], strides = [1, 1]} : vector<16x128xf32> to vector<1x32xf32>
    %9 = vector.broadcast %8 : vector<1x32xf32> to vector<16x32xf32>
    %10 = arith.addf %7, %9 : vector<16x32xf32>
    %cst_10 = arith.constant 5.000000e-01 : f32
    %11 = vector.broadcast %cst_10 : f32 to vector<16x32xf32>
    %12 = arith.mulf %11, %10 : vector<16x32xf32>
    %cst_11 = arith.constant 4.471500e-02 : f32
    %13 = vector.broadcast %cst_11 : f32 to vector<16x32xf32>
    %14 = arith.mulf %13, %10 : vector<16x32xf32>
    %15 = arith.mulf %14, %10 : vector<16x32xf32>
    %16 = arith.mulf %15, %10 : vector<16x32xf32>
    %17 = arith.addf %10, %16 : vector<16x32xf32>
    %cst_12 = arith.constant 0.797884583 : f32
    %18 = vector.broadcast %cst_12 : f32 to vector<16x32xf32>
    %19 = arith.mulf %18, %17 : vector<16x32xf32>
    %20 = math.tanh %19 : vector<16x32xf32>
    %cst_13 = arith.constant 1.000000e+00 : f32
    %21 = vector.broadcast %cst_13 : f32 to vector<16x32xf32>
    %22 = arith.addf %21, %20 : vector<16x32xf32>
    %23 = arith.mulf %12, %22 : vector<16x32xf32>
    %cst_14 = arith.constant dense<0.000000e+00> : vector<16xf32>
    %24 = vector.multi_reduction <add>, %23, %cst_14 [1] : vector<16x32xf32> to vector<16xf32>
    %25 = vector.shape_cast %24 : vector<16xf32> to vector<16x1xf32>
    %cst_15 = arith.constant 3.200000e+01 : f32
    %26 = vector.broadcast %cst_15 : f32 to vector<16x1xf32>
    %27 = arith.divf %25, %26 : vector<16x1xf32>
    %28 = vector.broadcast %27 : vector<16x1xf32> to vector<16x32xf32>
    %29 = arith.subf %23, %28 : vector<16x32xf32>
    %30 = arith.mulf %29, %29 : vector<16x32xf32>
    %cst_16 = arith.constant dense<0.000000e+00> : vector<16xf32>
    %31 = vector.multi_reduction <add>, %30, %cst_16 [1] : vector<16x32xf32> to vector<16xf32>
    %32 = vector.shape_cast %31 : vector<16xf32> to vector<16x1xf32>
    %cst_17 = arith.constant 3.200000e+01 : f32
    %33 = vector.broadcast %cst_17 : f32 to vector<16x1xf32>
    %34 = arith.divf %32, %33 : vector<16x1xf32>
    %35 = vector.broadcast %27 : vector<16x1xf32> to vector<16x32xf32>
    %36 = arith.subf %23, %35 : vector<16x32xf32>
    %cst_18 = arith.constant 9.99999974E-6 : f32
    %37 = vector.broadcast %cst_18 : f32 to vector<16x1xf32>
    %38 = arith.addf %34, %37 : vector<16x1xf32>
    %39 = math.rsqrt %38 : vector<16x1xf32>
    %40 = vector.broadcast %39 : vector<16x1xf32> to vector<16x32xf32>
    %41 = arith.mulf %36, %40 : vector<16x32xf32>
    %42 = vector.extract_strided_slice %0 {offsets = [1, 0], sizes = [1, 32], strides = [1, 1]} : vector<16x128xf32> to vector<1x32xf32>
    %43 = vector.broadcast %42 : vector<1x32xf32> to vector<16x32xf32>
    %44 = arith.mulf %41, %43 : vector<16x32xf32>
    %45 = vector.extract_strided_slice %0 {offsets = [2, 0], sizes = [1, 32], strides = [1, 1]} : vector<16x128xf32> to vector<1x32xf32>
    %46 = vector.broadcast %45 : vector<1x32xf32> to vector<16x32xf32>
    %47 = arith.addf %44, %46 : vector<16x32xf32>
    %c0_19 = arith.constant 0 : index
    %c0_20 = arith.constant 0 : index
    %48 = vector.load %arg4[%c0_19, %c0_20] : memref<16x12xf32, #tpu.memory_space<vmem>>, vector<16x12xf32>
    %c0_21 = arith.constant 0 : index
    %c0_22 = arith.constant 0 : index
    %49 = vector.load %arg6[%c0_21, %c0_22] : memref<12x16xf32, #tpu.memory_space<vmem>>, vector<12x16xf32>
    %cst_23 = arith.constant dense<0.000000e+00> : vector<16x16xf32>
    %50 = tpu.matmul %48, %49, %cst_23 {dimension_numbers = #tpu.dot_dimension_numbers<[1], [0], [0], [1], [0, 0, 1, 1], [], []>} : vector<16x12xf32>, vector<12x16xf32>, vector<16x16xf32> -> vector<16x16xf32>
    %51 = vector.extract_strided_slice %0 {offsets = [3, 0], sizes = [1, 16], strides = [1, 1]} : vector<16x128xf32> to vector<1x16xf32>
    %52 = vector.broadcast %51 : vector<1x16xf32> to vector<16x16xf32>
    %53 = arith.addf %50, %52 : vector<16x16xf32>
    %cst_24 = arith.constant dense<0.000000e+00> : vector<16xf32>
    %54 = vector.multi_reduction <add>, %53, %cst_24 [1] : vector<16x16xf32> to vector<16xf32>
    %55 = vector.shape_cast %54 : vector<16xf32> to vector<16x1xf32>
    %cst_25 = arith.constant 1.600000e+01 : f32
    %56 = vector.broadcast %cst_25 : f32 to vector<16x1xf32>
    %57 = arith.divf %55, %56 : vector<16x1xf32>
    %58 = vector.broadcast %57 : vector<16x1xf32> to vector<16x16xf32>
    %59 = arith.subf %53, %58 : vector<16x16xf32>
    %60 = arith.mulf %59, %59 : vector<16x16xf32>
    %cst_26 = arith.constant dense<0.000000e+00> : vector<16xf32>
    %61 = vector.multi_reduction <add>, %60, %cst_26 [1] : vector<16x16xf32> to vector<16xf32>
    %62 = vector.shape_cast %61 : vector<16xf32> to vector<16x1xf32>
    %cst_27 = arith.constant 1.600000e+01 : f32
    %63 = vector.broadcast %cst_27 : f32 to vector<16x1xf32>
    %64 = arith.divf %62, %63 : vector<16x1xf32>
    %65 = vector.broadcast %57 : vector<16x1xf32> to vector<16x16xf32>
    %66 = arith.subf %53, %65 : vector<16x16xf32>
    %cst_28 = arith.constant 9.99999974E-6 : f32
    %67 = vector.broadcast %cst_28 : f32 to vector<16x1xf32>
    %68 = arith.addf %64, %67 : vector<16x1xf32>
    %69 = math.rsqrt %68 : vector<16x1xf32>
    %70 = vector.broadcast %69 : vector<16x1xf32> to vector<16x16xf32>
    %71 = arith.mulf %66, %70 : vector<16x16xf32>
    %72 = vector.extract_strided_slice %0 {offsets = [4, 0], sizes = [1, 16], strides = [1, 1]} : vector<16x128xf32> to vector<1x16xf32>
    %73 = vector.broadcast %72 : vector<1x16xf32> to vector<16x16xf32>
    %74 = arith.mulf %71, %73 : vector<16x16xf32>
    %75 = vector.extract_strided_slice %0 {offsets = [5, 0], sizes = [1, 16], strides = [1, 1]} : vector<16x128xf32> to vector<1x16xf32>
    %76 = vector.broadcast %75 : vector<1x16xf32> to vector<16x16xf32>
    %77 = arith.addf %74, %76 : vector<16x16xf32>
    %cst_29 = arith.constant 5.000000e-01 : f32
    %78 = vector.broadcast %cst_29 : f32 to vector<16x16xf32>
    %79 = arith.mulf %78, %77 : vector<16x16xf32>
    %cst_30 = arith.constant 4.471500e-02 : f32
    %80 = vector.broadcast %cst_30 : f32 to vector<16x16xf32>
    %81 = arith.mulf %80, %77 : vector<16x16xf32>
    %82 = arith.mulf %81, %77 : vector<16x16xf32>
    %83 = arith.mulf %82, %77 : vector<16x16xf32>
    %84 = arith.addf %77, %83 : vector<16x16xf32>
    %cst_31 = arith.constant 0.797884583 : f32
    %85 = vector.broadcast %cst_31 : f32 to vector<16x16xf32>
    %86 = arith.mulf %85, %84 : vector<16x16xf32>
    %87 = math.tanh %86 : vector<16x16xf32>
    %cst_32 = arith.constant 1.000000e+00 : f32
    %88 = vector.broadcast %cst_32 : f32 to vector<16x16xf32>
    %89 = arith.addf %88, %87 : vector<16x16xf32>
    %90 = arith.mulf %79, %89 : vector<16x16xf32>
    %c0_33 = arith.constant 0 : index
    %c0_34 = arith.constant 0 : index
    %91 = vector.load %arg7[%c0_33, %c0_34] : memref<32x40xf32, #tpu.memory_space<vmem>>, vector<32x40xf32>
    %cst_35 = arith.constant dense<0.000000e+00> : vector<16x40xf32>
    %92 = tpu.matmul %47, %91, %cst_35 {dimension_numbers = #tpu.dot_dimension_numbers<[1], [0], [0], [1], [0, 0, 1, 1], [], []>} : vector<16x32xf32>, vector<32x40xf32>, vector<16x40xf32> -> vector<16x40xf32>
    %c0_36 = arith.constant 0 : index
    %c0_37 = arith.constant 0 : index
    %93 = vector.load %arg8[%c0_36, %c0_37] : memref<128x40xf32, #tpu.memory_space<vmem>>, vector<128x40xf32>
    %cst_38 = arith.constant dense<0.000000e+00> : vector<16x40xf32>
    %94 = tpu.matmul %1, %93, %cst_38 {dimension_numbers = #tpu.dot_dimension_numbers<[1], [0], [0], [1], [0, 0, 1, 1], [], []>} : vector<16x128xf32>, vector<128x40xf32>, vector<16x40xf32> -> vector<16x40xf32>
    %95 = arith.addf %92, %94 : vector<16x40xf32>
    %c0_39 = arith.constant 0 : index
    %c0_40 = arith.constant 0 : index
    %96 = vector.load %arg9[%c0_39, %c0_40] : memref<16x40xf32, #tpu.memory_space<vmem>>, vector<16x40xf32>
    %cst_41 = arith.constant dense<0.000000e+00> : vector<16x40xf32>
    %97 = tpu.matmul %90, %96, %cst_41 {dimension_numbers = #tpu.dot_dimension_numbers<[1], [0], [0], [1], [0, 0, 1, 1], [], []>} : vector<16x16xf32>, vector<16x40xf32>, vector<16x40xf32> -> vector<16x40xf32>
    %98 = arith.addf %95, %97 : vector<16x40xf32>
    %99 = vector.extract_strided_slice %0 {offsets = [6, 0], sizes = [1, 40], strides = [1, 1]} : vector<16x128xf32> to vector<1x40xf32>
    %100 = vector.broadcast %99 : vector<1x40xf32> to vector<16x40xf32>
    %101 = arith.addf %98, %100 : vector<16x40xf32>
    %cst_42 = arith.constant dense<0.000000e+00> : vector<16xf32>
    %102 = vector.multi_reduction <add>, %101, %cst_42 [1] : vector<16x40xf32> to vector<16xf32>
    %103 = vector.shape_cast %102 : vector<16xf32> to vector<16x1xf32>
    %cst_43 = arith.constant 4.000000e+01 : f32
    %104 = vector.broadcast %cst_43 : f32 to vector<16x1xf32>
    %105 = arith.divf %103, %104 : vector<16x1xf32>
    %106 = vector.broadcast %105 : vector<16x1xf32> to vector<16x40xf32>
    %107 = arith.subf %101, %106 : vector<16x40xf32>
    %108 = arith.mulf %107, %107 : vector<16x40xf32>
    %cst_44 = arith.constant dense<0.000000e+00> : vector<16xf32>
    %109 = vector.multi_reduction <add>, %108, %cst_44 [1] : vector<16x40xf32> to vector<16xf32>
    %110 = vector.shape_cast %109 : vector<16xf32> to vector<16x1xf32>
    %cst_45 = arith.constant 4.000000e+01 : f32
    %111 = vector.broadcast %cst_45 : f32 to vector<16x1xf32>
    %112 = arith.divf %110, %111 : vector<16x1xf32>
    %113 = vector.broadcast %105 : vector<16x1xf32> to vector<16x40xf32>
    %114 = arith.subf %101, %113 : vector<16x40xf32>
    %cst_46 = arith.constant 9.99999974E-6 : f32
    %115 = vector.broadcast %cst_46 : f32 to vector<16x1xf32>
    %116 = arith.addf %112, %115 : vector<16x1xf32>
    %117 = math.rsqrt %116 : vector<16x1xf32>
    %118 = vector.broadcast %117 : vector<16x1xf32> to vector<16x40xf32>
    %119 = arith.mulf %114, %118 : vector<16x40xf32>
    %120 = vector.extract_strided_slice %0 {offsets = [7, 0], sizes = [1, 40], strides = [1, 1]} : vector<16x128xf32> to vector<1x40xf32>
    %121 = vector.broadcast %120 : vector<1x40xf32> to vector<16x40xf32>
    %122 = arith.mulf %119, %121 : vector<16x40xf32>
    %123 = vector.extract_strided_slice %0 {offsets = [8, 0], sizes = [1, 40], strides = [1, 1]} : vector<16x128xf32> to vector<1x40xf32>
    %124 = vector.broadcast %123 : vector<1x40xf32> to vector<16x40xf32>
    %125 = arith.addf %122, %124 : vector<16x40xf32>
    %cst_47 = arith.constant 5.000000e-01 : f32
    %126 = vector.broadcast %cst_47 : f32 to vector<16x40xf32>
    %127 = arith.mulf %126, %125 : vector<16x40xf32>
    %cst_48 = arith.constant 4.471500e-02 : f32
    %128 = vector.broadcast %cst_48 : f32 to vector<16x40xf32>
    %129 = arith.mulf %128, %125 : vector<16x40xf32>
    %130 = arith.mulf %129, %125 : vector<16x40xf32>
    %131 = arith.mulf %130, %125 : vector<16x40xf32>
    %132 = arith.addf %125, %131 : vector<16x40xf32>
    %cst_49 = arith.constant 0.797884583 : f32
    %133 = vector.broadcast %cst_49 : f32 to vector<16x40xf32>
    %134 = arith.mulf %133, %132 : vector<16x40xf32>
    %135 = math.tanh %134 : vector<16x40xf32>
    %cst_50 = arith.constant 1.000000e+00 : f32
    %136 = vector.broadcast %cst_50 : f32 to vector<16x40xf32>
    %137 = arith.addf %136, %135 : vector<16x40xf32>
    %138 = arith.mulf %127, %137 : vector<16x40xf32>
    %c0_51 = arith.constant 0 : index
    %c0_52 = arith.constant 0 : index
    %139 = vector.load %arg10[%c0_51, %c0_52] : memref<128x24xf32, #tpu.memory_space<vmem>>, vector<128x24xf32>
    %cst_53 = arith.constant dense<0.000000e+00> : vector<16x24xf32>
    %140 = tpu.matmul %1, %139, %cst_53 {dimension_numbers = #tpu.dot_dimension_numbers<[1], [0], [0], [1], [0, 0, 1, 1], [], []>} : vector<16x128xf32>, vector<128x24xf32>, vector<16x24xf32> -> vector<16x24xf32>
    %c0_54 = arith.constant 0 : index
    %c0_55 = arith.constant 0 : index
    %141 = vector.load %arg11[%c0_54, %c0_55] : memref<16x24xf32, #tpu.memory_space<vmem>>, vector<16x24xf32>
    %cst_56 = arith.constant dense<0.000000e+00> : vector<16x24xf32>
    %142 = tpu.matmul %90, %141, %cst_56 {dimension_numbers = #tpu.dot_dimension_numbers<[1], [0], [0], [1], [0, 0, 1, 1], [], []>} : vector<16x16xf32>, vector<16x24xf32>, vector<16x24xf32> -> vector<16x24xf32>
    %143 = arith.addf %140, %142 : vector<16x24xf32>
    %144 = vector.extract_strided_slice %0 {offsets = [9, 0], sizes = [1, 24], strides = [1, 1]} : vector<16x128xf32> to vector<1x24xf32>
    %145 = vector.broadcast %144 : vector<1x24xf32> to vector<16x24xf32>
    %146 = arith.addf %143, %145 : vector<16x24xf32>
    %cst_57 = arith.constant dense<0.000000e+00> : vector<16xf32>
    %147 = vector.multi_reduction <add>, %146, %cst_57 [1] : vector<16x24xf32> to vector<16xf32>
    %148 = vector.shape_cast %147 : vector<16xf32> to vector<16x1xf32>
    %cst_58 = arith.constant 2.400000e+01 : f32
    %149 = vector.broadcast %cst_58 : f32 to vector<16x1xf32>
    %150 = arith.divf %148, %149 : vector<16x1xf32>
    %151 = vector.broadcast %150 : vector<16x1xf32> to vector<16x24xf32>
    %152 = arith.subf %146, %151 : vector<16x24xf32>
    %153 = arith.mulf %152, %152 : vector<16x24xf32>
    %cst_59 = arith.constant dense<0.000000e+00> : vector<16xf32>
    %154 = vector.multi_reduction <add>, %153, %cst_59 [1] : vector<16x24xf32> to vector<16xf32>
    %155 = vector.shape_cast %154 : vector<16xf32> to vector<16x1xf32>
    %cst_60 = arith.constant 2.400000e+01 : f32
    %156 = vector.broadcast %cst_60 : f32 to vector<16x1xf32>
    %157 = arith.divf %155, %156 : vector<16x1xf32>
    %158 = vector.broadcast %150 : vector<16x1xf32> to vector<16x24xf32>
    %159 = arith.subf %146, %158 : vector<16x24xf32>
    %cst_61 = arith.constant 9.99999974E-6 : f32
    %160 = vector.broadcast %cst_61 : f32 to vector<16x1xf32>
    %161 = arith.addf %157, %160 : vector<16x1xf32>
    %162 = math.rsqrt %161 : vector<16x1xf32>
    %163 = vector.broadcast %162 : vector<16x1xf32> to vector<16x24xf32>
    %164 = arith.mulf %159, %163 : vector<16x24xf32>
    %165 = vector.extract_strided_slice %0 {offsets = [10, 0], sizes = [1, 24], strides = [1, 1]} : vector<16x128xf32> to vector<1x24xf32>
    %166 = vector.broadcast %165 : vector<1x24xf32> to vector<16x24xf32>
    %167 = arith.mulf %164, %166 : vector<16x24xf32>
    %168 = vector.extract_strided_slice %0 {offsets = [11, 0], sizes = [1, 24], strides = [1, 1]} : vector<16x128xf32> to vector<1x24xf32>
    %169 = vector.broadcast %168 : vector<1x24xf32> to vector<16x24xf32>
    %170 = arith.addf %167, %169 : vector<16x24xf32>
    %cst_62 = arith.constant 5.000000e-01 : f32
    %171 = vector.broadcast %cst_62 : f32 to vector<16x24xf32>
    %172 = arith.mulf %171, %170 : vector<16x24xf32>
    %cst_63 = arith.constant 4.471500e-02 : f32
    %173 = vector.broadcast %cst_63 : f32 to vector<16x24xf32>
    %174 = arith.mulf %173, %170 : vector<16x24xf32>
    %175 = arith.mulf %174, %170 : vector<16x24xf32>
    %176 = arith.mulf %175, %170 : vector<16x24xf32>
    %177 = arith.addf %170, %176 : vector<16x24xf32>
    %cst_64 = arith.constant 0.797884583 : f32
    %178 = vector.broadcast %cst_64 : f32 to vector<16x24xf32>
    %179 = arith.mulf %178, %177 : vector<16x24xf32>
    %180 = math.tanh %179 : vector<16x24xf32>
    %cst_65 = arith.constant 1.000000e+00 : f32
    %181 = vector.broadcast %cst_65 : f32 to vector<16x24xf32>
    %182 = arith.addf %181, %180 : vector<16x24xf32>
    %183 = arith.mulf %172, %182 : vector<16x24xf32>
    %c0_66 = arith.constant 0 : index
    %c0_67 = arith.constant 0 : index
    %184 = vector.load %arg12[%c0_66, %c0_67] : memref<40x128xf32, #tpu.memory_space<vmem>>, vector<40x128xf32>
    %cst_68 = arith.constant dense<0.000000e+00> : vector<16x128xf32>
    %185 = tpu.matmul %138, %184, %cst_68 {dimension_numbers = #tpu.dot_dimension_numbers<[1], [0], [0], [1], [0, 0, 1, 1], [], []>} : vector<16x40xf32>, vector<40x128xf32>, vector<16x128xf32> -> vector<16x128xf32>
    %c0_69 = arith.constant 0 : index
    %c0_70 = arith.constant 0 : index
    %186 = vector.load %arg13[%c0_69, %c0_70] : memref<24x128xf32, #tpu.memory_space<vmem>>, vector<24x128xf32>
    %cst_71 = arith.constant dense<0.000000e+00> : vector<16x128xf32>
    %187 = tpu.matmul %183, %186, %cst_71 {dimension_numbers = #tpu.dot_dimension_numbers<[1], [0], [0], [1], [0, 0, 1, 1], [], []>} : vector<16x24xf32>, vector<24x128xf32>, vector<16x128xf32> -> vector<16x128xf32>
    %188 = arith.addf %185, %187 : vector<16x128xf32>
    %189 = vector.extract_strided_slice %0 {offsets = [12, 0], sizes = [1, 128], strides = [1, 1]} : vector<16x128xf32> to vector<1x128xf32>
    %190 = vector.broadcast %189 : vector<1x128xf32> to vector<16x128xf32>
    %191 = arith.addf %188, %190 : vector<16x128xf32>
    %c0_72 = arith.constant 0 : index
    %c0_73 = arith.constant 0 : index
    %192 = vector.load %arg15[%c0_72, %c0_73] : memref<16x128xf32, #tpu.memory_space<vmem>>, vector<16x128xf32>
    tpu.vector_store %arg15[%c0_72, %c0_73], %191 {strides = array<i32>} : memref<16x128xf32, #tpu.memory_space<vmem>>, vector<16x128xf32>,
    return
  }
  func.func @transform_0(%arg0: i32) -> (i32, i32) {
    %c0_i32 = arith.constant 0 : i32
    %c0_i32_0 = arith.constant 0 : i32
    return %arg0, %c0_i32 : i32, i32
  }
  func.func @transform_1(%arg0: i32) -> (i32, i32) {
    %c0_i32 = arith.constant 0 : i32
    %c0_i32_0 = arith.constant 0 : i32
    %c0_i32_1 = arith.constant 0 : i32
    return %c0_i32, %c0_i32_0 : i32, i32
  }
  func.func @transform_2(%arg0: i32) -> (i32, i32) {
    %c0_i32 = arith.constant 0 : i32
    %c0_i32_0 = arith.constant 0 : i32
    return %arg0, %c0_i32 : i32, i32
  }
  func.func @transform_3(%arg0: i32) -> (i32, i32) {
    %c0_i32 = arith.constant 0 : i32
    %c0_i32_0 = arith.constant 0 : i32
    return %arg0, %c0_i32 : i32, i32
  }
  func.func @transform_4(%arg0: i32) -> (i32, i32) {
    %c0_i32 = arith.constant 0 : i32
    %c0_i32_0 = arith.constant 0 : i32
    %c0_i32_1 = arith.constant 0 : i32
    return %c0_i32, %c0_i32_0 : i32, i32
  }
  func.func @transform_5(%arg0: i32) -> (i32, i32) {
    %c0_i32 = arith.constant 0 : i32
    %c0_i32_0 = arith.constant 0 : i32
    %c0_i32_1 = arith.constant 0 : i32
    return %c0_i32, %c0_i32_0 : i32, i32
  }
  func.func @transform_6(%arg0: i32) -> (i32, i32) {
    %c0_i32 = arith.constant 0 : i32
    %c0_i32_0 = arith.constant 0 : i32
    %c0_i32_1 = arith.constant 0 : i32
    return %c0_i32, %c0_i32_0 : i32, i32
  }
  func.func @transform_7(%arg0: i32) -> (i32, i32) {
    %c0_i32 = arith.constant 0 : i32
    %c0_i32_0 = arith.constant 0 : i32
    %c0_i32_1 = arith.constant 0 : i32
    return %c0_i32, %c0_i32_0 : i32, i32
  }
  func.func @transform_8(%arg0: i32) -> (i32, i32) {
    %c0_i32 = arith.constant 0 : i32
    %c0_i32_0 = arith.constant 0 : i32
    %c0_i32_1 = arith.constant 0 : i32
    return %c0_i32, %c0_i32_0 : i32, i32
  }
  func.func @transform_9(%arg0: i32) -> (i32, i32) {
    %c0_i32 = arith.constant 0 : i32
    %c0_i32_0 = arith.constant 0 : i32
    %c0_i32_1 = arith.constant 0 : i32
    return %c0_i32, %c0_i32_0 : i32, i32
  }
  func.func @transform_10(%arg0: i32) -> (i32, i32) {
    %c0_i32 = arith.constant 0 : i32
    %c0_i32_0 = arith.constant 0 : i32
    %c0_i32_1 = arith.constant 0 : i32
    return %c0_i32, %c0_i32_0 : i32, i32
  }
  func.func @transform_11(%arg0: i32) -> (i32, i32) {
    %c0_i32 = arith.constant 0 : i32
    %c0_i32_0 = arith.constant 0 : i32
    %c0_i32_1 = arith.constant 0 : i32
    return %c0_i32, %c0_i32_0 : i32, i32
  }
  func.func @transform_12(%arg0: i32) -> (i32, i32) {
    %c0_i32 = arith.constant 0 : i32
    %c0_i32_0 = arith.constant 0 : i32
    %c0_i32_1 = arith.constant 0 : i32
    return %c0_i32, %c0_i32_0 : i32, i32
  }
  func.func @transform_13(%arg0: i32) -> (i32, i32) {
    %c0_i32 = arith.constant 0 : i32
    %c0_i32_0 = arith.constant 0 : i32
    %c0_i32_1 = arith.constant 0 : i32
    return %c0_i32, %c0_i32_0 : i32, i32
  }
  func.func @transform_14(%arg0: i32) -> (i32, i32) {
    %c0_i32 = arith.constant 0 : i32
    %c0_i32_0 = arith.constant 0 : i32
    return %arg0, %c0_i32 : i32, i32
  }
}

</mosaic_0001>

<bundles_post_ra>
// kernel: _lambda_.2
= control target key start
LH: loop header
LB: loop body
LE: loop exit
PB: predicated region body
PF: predicated region fallthrough
CT: control target
= control target key end

     0   :  { %s1586_s18 = smov 0   ;;  %s1979_s0 = inlined_call_operand.vmem [shape: f32[128,10], index: 0, kind: input, shape index: {}]   ;;  %s1980_s1 = inlined_call_operand.vmem [shape: f32[10,32], index: 1, kind: input, shape index: {}]   ;;  %s1981_s2 = inlined_call_operand.vmem [shape: f32[16,32], index: 2, kind: input, shape index: {}]   ;;  %s1982_s3 = inlined_call_operand.vmem [shape: f32[32,32], index: 3, kind: input, shape index: {}]   ;;  %s1983_s4 = inlined_call_operand.vmem [shape: f32[32,32], index: 4, kind: input, shape index: {}]   ;;  %s1984_s5 = inlined_call_operand.vmem [shape: f32[128,128], index: 5, kind: output, shape index: {}]  }
   0x1 LB: > { %s1295_s19 = sadd.s32 4294967295, %s1551_s18   ;;  %p1299_p0 = scmp.ge.s32.totalorder %s1551_s18, 1  ;;  %s1551_s18 = sphi %s1586_s18, %s15_s18  }
   0x2   : > { %p188_p1 = scmp.lt.s32.totalorder %s1551_s18, 3 }
   0x4   : > { %p189_p2 = pnand %p1299_p0, %p188_p1 }
   0x5   : > { %v295_v0 = vld [vmem:[%s1980_s1] sm:$0xff] (!%p189_p2)  ;;  %v296_v1 = vld [vmem:[%s1980_s1 + $0x8] sm:$0x3] (!%p189_p2)  ;;  %vm325_vm0 = vcmask (!%p189_p2), 1041408   ;;  %s1300_s24 = sshll.u32 (!%p189_p2), %s1295_s19, 3  ;;  %vm1553_vm1 = vmmov (!%p189_p2), 1   ;;  %v297_v27 = vlaneseq (!%p189_p2) }
   0x6   : > { %192 = sbr.rel (%p189_p2) target bundleno = 1775 (0x6ef), region = 40  ;;  %v1429_v2 = vpack.c.bf16 (!%p189_p2), %v296_v1, %v295_v0  ;;  %vm1430_vm2 = vmpackc.low (!%p189_p2), %vm325_vm0, %vm1553_vm1  ;;  %p217_p3 = scmp.lt.s32.totalorder (!%p189_p2), %s1300_s24, 15  ;;  %vm246_vm3 = vcmask (!%p189_p2), 80896   ;;  %v1630_v30 = vld [vmem:[%s1981_s2] sm:$0xff] (!%p189_p2)  ;;  %v1554_v54 = vmov (!%p189_p2), 0.0   ;;  %vm450_vm8 = vcmask (!%p189_p2), 261120  }
   0x7   : > { %v1624_v28 = vshrl.u32 (!%p189_p2), %v297_v27, 7  ;;  %s1555_s29 = smov (!%p189_p2), 32   ;;  %vm1222_vm13 = vcmask (!%p189_p2), 523264  }
   0x8   : > { %1431 = vmatprep.subr.msk.bf16.mxu0 (!%p189_p2), %vm1430_vm2, %v1429_v2  ;;  %1451 = vmatprep.subr.msk.bf16.mxu1 (!%p189_p2), %vm1430_vm2, %v1429_v2 }
   0x9   : > { %1434 = vmatpush3.bf16.msk.msra.mxu0 (!%p189_p2), %vm1430_vm2, %v1429_v2  ;;  %1452 = vmatpush3.bf16.msk.msra.mxu1 (!%p189_p2), %vm1430_vm2, %v1429_v2  ;;  %v299_v29 = vsub.s32 (!%p189_p2), 0, %v1624_v28 }
   0xb   : > { %v300_v32 = vrot.slane (!%p189_p2), %v1630_v30, %v299_v29 }
   0xd   : > { %s1986_s24 = smov (!%p217_p3, %s1300_s24), 15 }
   0xe   : > { %s1301_s25 = sshll.u32 %s1986_s24, 3 }
   0xf   : > { %s220_s28 = scalar_lea.vmem %s1979_s0, %s1301_s25  ;;  %s1942_s7 = scalar_lea.vmem %s1984_s5, %s1301_s25 }
  0x10   : > { %v228_v3 = vld [vmem:[%s220_s28] sm:$0xff]  ;;  %v229_v4 = vld [vmem:[%s220_s28 + $0x8] sm:$0xff]  ;;  %v230_v5 = vld [vmem:[%s220_s28 + $0x10] sm:$0xff] }
  0x11   : > { %v238_v6 = vand.u32 2147483647, %v228_v3  ;;  %1377 = vmatprep.mubr.msk.f32.mxu0 %vm246_vm3, %v228_v3  ;;  %v232_v7 = vld [vmem:[%s220_s28 + $0x20] sm:$0xff]  ;;  %v233_v8 = vld [vmem:[%s220_s28 + $0x28] sm:$0xff]  ;;  %v231_v9 = vld [vmem:[%s220_s28 + $0x18] sm:$0xff] }
  0x12   : > { %1378 = vmatmul.mubr.msk.f32.vlgmr.msra.gmra.mrb[0].mxu0 %vm246_vm3, %v229_v4  ;;  %1383 = vmatprep.mubr.msk.f32.mxu1 %vm246_vm3, %v232_v7  ;;  %v234_v10 = vld [vmem:[%s220_s28 + $0x30] sm:$0xff]  ;;  %v240_v11 = vand.u32 2147483647, %v230_v5  ;;  %v239_v13 = vand.u32 2147483647, %v229_v4  ;;  %v235_v15 = vld [vmem:[%s220_s28 + $0x38] sm:$0xff] }
  0x13   : > { %1380 = vmatprep.mubr.msk.f32.mxu0 %vm246_vm3, %v230_v5  ;;  %1384 = vmatmul.mubr.msk.f32.vlgmr.msra.gmra.mrb[0].mxu1 %vm246_vm3, %v233_v8  ;;  %v247_v12 = vsel %vm246_vm3, %v238_v6, 0.0  ;;  %v241_v14 = vand.u32 2147483647, %v231_v9  ;;  %v242_v17 = vand.u32 2147483647, %v232_v7 }
  0x14   : > { %1386 = vmatprep.mubr.msk.f32.mxu1 %vm246_vm3, %v234_v10  ;;  %248 = vadd.xlane.f32.xlu0 %v247_v12  ;;  %v253_v16 = vsel %vm246_vm3, %v240_v11, 0.0  ;;  %v250_v18 = vsel %vm246_vm3, %v239_v13, 0.0  ;;  %v243_v20 = vand.u32 2147483647, %v233_v8  ;;  %v244_v22 = vand.u32 2147483647, %v234_v10 }
  0x15   : > { %254 = vadd.xlane.f32.xlu1 %v253_v16  ;;  %v256_v19 = vsel %vm246_vm3, %v241_v14, 0.0  ;;  %v259_v21 = vsel %vm246_vm3, %v242_v17, 0.0  ;;  %v245_v24 = vand.u32 2147483647, %v235_v15 }
  0x16   : > { %1381 = vmatmul.mubr.msk.f32.gmra.mrb[2].mxu0 %vm246_vm3, %v231_v9  ;;  %v262_v23 = vsel %vm246_vm3, %v243_v20, 0.0  ;;  %v265_v25 = vsel %vm246_vm3, %v244_v22, 0.0 }
  0x17   : > { %1387 = vmatmul.mubr.msk.f32.gmra.mrb[2].mxu1 %vm246_vm3, %v235_v15  ;;  %v268_v26 = vsel %vm246_vm3, %v245_v24, 0.0 }
  0x18   : > { %251 = vadd.xlane.f32.xlu0 %v250_v18 }
  0x19   : > { %257 = vadd.xlane.f32.xlu1 %v256_v19 }
  0x1c   : > { %260 = vadd.xlane.f32.xlu0 %v259_v21 }
  0x1d   : > { %263 = vadd.xlane.f32.xlu1 %v262_v23 }
  0x20   : > { %266 = vadd.xlane.f32.xlu0 %v265_v25 }
  0x21   : > { %269 = vadd.xlane.f32.xlu1 %v268_v26 }
  0xa1   : > { %v249_v33 = vpop.xlane.xlu0 %248 }
  0xa2   : > { %v255_v31 = vpop.xlane.xlu1 %254  ;;  %vm271_vm5 = vcmp.gt.f32.partialorder %v249_v33, 0.0 }
  0xa3   : > { %v1304_v59 = vsel %vm271_vm5, 1.0, %v1554_v54  ;;  %vm273_vm10 = vcmp.gt.f32.partialorder %v255_v31, 0.0 }
  0xa4   : > { %v1306_v8 = vsel %vm273_vm10, 1.0, %v1554_v54 }
  0xa5   : > { %v252_v44 = vpop.xlane.xlu0 %251 }
  0xa6   : > { %v258_v35 = vpop.xlane.xlu1 %257  ;;  %vm272_vm4 = vcmp.gt.f32.partialorder %v252_v44, 0.0 }
  0xa7   : > { %v1305_v55 = vsel %vm272_vm4, 1.0, %v1554_v54  ;;  %vm274_vm6 = vcmp.gt.f32.partialorder %v258_v35, 0.0 }
  0xa8   : > { %v1307_v63 = vsel %vm274_vm6, 1.0, %v1554_v54 }
  0xa9   : > { %v261_v53 = vpop.xlane.xlu0 %260 }
  0xaa   : > { %v264_v52 = vpop.xlane.xlu1 %263  ;;  %vm275_vm9 = vcmp.gt.f32.partialorder %v261_v53, 0.0 }
  0xab   : > { %vm276_vm7 = vcmp.gt.f32.partialorder %v264_v52, 0.0  ;;  %v1308_v4 = vsel %vm275_vm9, 1.0, %v1554_v54 }
  0xac   : > { %v1309_v1 = vsel %vm276_vm7, 1.0, %v1554_v54 }
  0xad   : > { %v267_v61 = vpop.xlane.xlu0 %266 }
  0xae   : > { %v270_v57 = vpop.xlane.xlu1 %269  ;;  %vm277_vm12 = vcmp.gt.f32.partialorder %v267_v61, 0.0 }
  0xaf   : > { %vm278_vm11 = vcmp.gt.f32.partialorder %v270_v57, 0.0  ;;  %v1310_v17 = vsel %vm277_vm12, 1.0, %v1554_v54 }
  0xb0   : > { %v1311_v13 = vsel %vm278_vm11, 1.0, %v1554_v54 }
  0xe5   : > { %v1379_v34 = vpop.f32.mrb[0].mxu0 }
  0xe6   : > { %v401_v36 = vadd.f32 %v1379_v34, %v300_v32  ;;  %v395_v37 = vpop.f32.mrb[1].mxu0  ;;  %v1385_v38 = vpop.f32.mrb[0].mxu1 }
  0xe7   : > { %v396_v39 = vadd.f32 %v395_v37, %v300_v32  ;;  %v421_v40 = vadd.f32 %v1385_v38, %v300_v32  ;;  %v415_v41 = vpop.f32.mrb[1].mxu1 }
  0xe8   : > { %1464 = vtanh.f32 %v401_v36  ;;  %v416_v42 = vadd.f32 %v415_v41, %v300_v32 }
  0xe9   : > { %1466 = vtanh.f32 %v396_v39  ;;  %v1382_v43 = vpop.f32.mrb[2].mxu0 }
  0xea   : > { %v411_v45 = vadd.f32 %v1382_v43, %v300_v32  ;;  %v405_v46 = vpop.f32.mrb[3].mxu0  ;;  %1468 = vtanh.f32 %v421_v40  ;;  %v1388_v47 = vpop.f32.mrb[2].mxu1 }
  0xeb   : > { %v406_v48 = vadd.f32 %v405_v46, %v300_v32  ;;  %1470 = vtanh.f32 %v416_v42  ;;  %v431_v49 = vadd.f32 %v1388_v47, %v300_v32  ;;  %v425_v50 = vpop.f32.mrb[3].mxu1 }
  0xec   : > { %1472 = vtanh.f32 %v411_v45  ;;  %v426_v51 = vadd.f32 %v425_v50, %v300_v32 }
  0xed   : > { %1474 = vtanh.f32 %v406_v48 }
  0xee   : > { %1476 = vtanh.f32 %v431_v49 }
  0xef   : > { %1478 = vtanh.f32 %v426_v51 }
  0xf2   : > { %v1465_v56 = vpop.eup %1464 }
  0xf3   : > { %v1467_v58 = vpop.eup %1466  ;;  %v443_v60 = vmul.f32 %v1465_v56, %v1305_v55 }
  0xf4   : > { %v1469_v62 = vpop.eup %1468  ;;  %v442_v0 = vmul.f32 %v1467_v58, %v1304_v59 }
  0xf5   : > { %v1471_v2 = vpop.eup %1470  ;;  %v454_v3 = vsel %vm450_vm8, %v443_v60, 0.0  ;;  %v447_v10 = vmul.f32 %v1469_v62, %v1309_v1 }
  0xf6   : > { %v1473_v5 = vpop.eup %1472  ;;  %455 = vadd.xlane.f32.xlu1 %v454_v3  ;;  %v451_v6 = vsel %vm450_vm8, %v442_v0, 0.0  ;;  %v446_v14 = vmul.f32 %v1471_v2, %v1308_v4  ;;  %v580_v4 = vld [vmem:[%s1982_s3] sm:$0xff] }
  0xf7   : > { %v1475_v7 = vpop.eup %1474  ;;  %452 = vadd.xlane.f32.xlu0 %v451_v6  ;;  %v445_v9 = vmul.f32 %v1473_v5, %v1307_v63  ;;  %v466_v19 = vsel %vm450_vm8, %v447_v10, 0.0  ;;  %v581_v5 = vld [vmem:[%s1982_s3 + $0x8] sm:$0xff] }
  0xf8   : > { %v1477_v11 = vpop.eup %1476  ;;  %v444_v12 = vmul.f32 %v1475_v7, %v1306_v8  ;;  %v463_v21 = vsel %vm450_vm8, %v446_v14, 0.0  ;;  %v1435_v6 = vpack.c.bf16 %v581_v5, %v580_v4  ;;  %v582_v7 = vld [vmem:[%s1982_s3 + $0x10] sm:$0xff]  ;;  %v583_v8 = vld [vmem:[%s1982_s3 + $0x18] sm:$0xff] }
  0xf9   : > { %v1479_v15 = vpop.eup %1478  ;;  %v460_v16 = vsel %vm450_vm8, %v445_v9, 0.0  ;;  %v449_v20 = vmul.f32 %v1477_v11, %v1311_v13 }
  0xfa   : > { %461 = vadd.xlane.f32.xlu1 %v460_v16  ;;  %v457_v18 = vsel %vm450_vm8, %v444_v12, 0.0  ;;  %v448_v22 = vmul.f32 %v1479_v15, %v1310_v17  ;;  %1436 = vmatprep.subr.bf16.mxu1 %v1435_v6 }
  0xfb   : > { %458 = vadd.xlane.f32.xlu0 %v457_v18  ;;  %v472_v23 = vsel %vm450_vm8, %v449_v20, 0.0  ;;  %1438 = vmatpush3.bf16.msra.mxu1 %v1435_v6 }
  0xfc   : > { %v469_v24 = vsel %vm450_vm8, %v448_v22, 0.0 }
  0xfe   : > { %467 = vadd.xlane.f32.xlu1 %v466_v19 }
  0xff   : > { %464 = vadd.xlane.f32.xlu0 %v463_v21 }
 0x102   : > { %473 = vadd.xlane.f32.xlu1 %v472_v23 }
 0x103   : > { %470 = vadd.xlane.f32.xlu0 %v469_v24 }
 0x183   : > { %v456_v25 = vpop.xlane.xlu1 %455 }
 0x184   : > { %v477_v26 = vmul.f32 0.03125, %v456_v25  ;;  %v453_v27 = vpop.xlane.xlu0 %452  ;;  %v558_v25 = vsub.s32 1, %v1624_v28 }
 0x185   : > { %v476_v31 = vmul.f32 0.03125, %v453_v27 }
 0x186   : > { %v1643_v32 = vsub.f32 %v443_v60, %v477_v26 }
 0x187   : > { %v1645_v33 = vsub.f32 %v442_v0, %v476_v31  ;;  %v462_v34 = vpop.xlane.xlu1 %461 }
 0x188   : > { %v479_v35 = vmul.f32 0.03125, %v462_v34  ;;  %v459_v36 = vpop.xlane.xlu0 %458  ;;  %v493_v37 = vmul.f32 %v1643_v32, %v1643_v32 }
 0x189   : > { %v478_v38 = vmul.f32 0.03125, %v459_v36  ;;  %v492_v39 = vmul.f32 %v1645_v33, %v1645_v33 }
 0x18a   : > { %v1651_v40 = vsub.f32 %v445_v9, %v479_v35  ;;  %v503_v41 = vsel %vm450_vm8, %v493_v37, 0.0  ;;  %v1439_v9 = vpack.c.bf16 %v583_v8, %v582_v7  ;;  %v570_v35 = vsub.s32 2, %v1624_v28 }
 0x18b   : > { %v1654_v42 = vsub.f32 %v444_v12, %v478_v38  ;;  %504 = vadd.xlane.f32.xlu1 %v503_v41  ;;  %v468_v43 = vpop.xlane.xlu1 %467  ;;  %v500_v44 = vsel %vm450_vm8, %v492_v39, 0.0  ;;  %v559_v38 = vrot.slane %v1630_v30, %v558_v25 }
 0x18c   : > { %v481_v45 = vmul.f32 0.03125, %v468_v43  ;;  %501 = vadd.xlane.f32.xlu0 %v500_v44  ;;  %v465_v46 = vpop.xlane.xlu0 %464  ;;  %v495_v47 = vmul.f32 %v1651_v40, %v1651_v40  ;;  %1440 = vmatprep.subr.bf16.mxu1 %v1439_v9 }
 0x18d   : > { %v480_v48 = vmul.f32 0.03125, %v465_v46  ;;  %v494_v49 = vmul.f32 %v1654_v42, %v1654_v42  ;;  %1442 = vmatpush3.bf16.msra.mxu1 %v1439_v9 }
 0x18e   : > { %v1661_v50 = vsub.f32 %v447_v10, %v481_v45  ;;  %v509_v51 = vsel %vm450_vm8, %v495_v47, 0.0  ;;  %v571_v47 = vrot.slane %v1630_v30, %v570_v35 }
 0x18f   : > { %v1664_v52 = vsub.f32 %v446_v14, %v480_v48  ;;  %510 = vadd.xlane.f32.xlu1 %v509_v51  ;;  %v474_v53 = vpop.xlane.xlu1 %473  ;;  %v506_v54 = vsel %vm450_vm8, %v494_v49, 0.0 }
 0x190   : > { %v483_v55 = vmul.f32 0.03125, %v474_v53  ;;  %507 = vadd.xlane.f32.xlu0 %v506_v54  ;;  %v471_v56 = vpop.xlane.xlu0 %470  ;;  %v497_v57 = vmul.f32 %v1661_v50, %v1661_v50 }
 0x191   : > { %v482_v58 = vmul.f32 0.03125, %v471_v56  ;;  %v496_v59 = vmul.f32 %v1664_v52, %v1664_v52 }
 0x192   : > { %v1671_v60 = vsub.f32 %v449_v20, %v483_v55  ;;  %v515_v61 = vsel %vm450_vm8, %v497_v57, 0.0 }
 0x193   : > { %v1674_v62 = vsub.f32 %v448_v22, %v482_v58  ;;  %516 = vadd.xlane.f32.xlu1 %v515_v61  ;;  %v512_v63 = vsel %vm450_vm8, %v496_v59, 0.0 }
 0x194   : > { %513 = vadd.xlane.f32.xlu0 %v512_v63  ;;  %v499_v0 = vmul.f32 %v1671_v60, %v1671_v60 }
 0x195   : > { %v498_v1 = vmul.f32 %v1674_v62, %v1674_v62 }
 0x196   : > { %v521_v2 = vsel %vm450_vm8, %v499_v0, 0.0 }
 0x197   : > { %522 = vadd.xlane.f32.xlu1 %v521_v2  ;;  %v518_v3 = vsel %vm450_vm8, %v498_v1, 0.0 }
 0x198   : > { %519 = vadd.xlane.f32.xlu0 %v518_v3 }
 0x218   : > { %v505_v10 = vpop.xlane.xlu1 %504 }
 0x219   : > { %v525_v11 = vmul.f32 0.03125, %v505_v10  ;;  %v502_v12 = vpop.xlane.xlu0 %501 }
 0x21a   : > { %v524_v13 = vmul.f32 0.03125, %v502_v12 }
 0x21b   : > { %v533_v14 = vadd.f32 1e-05, %v525_v11 }
 0x21c   : > { %v532_v15 = vadd.f32 1e-05, %v524_v13  ;;  %v511_v16 = vpop.xlane.xlu1 %510 }
 0x21d   : > { %1480 = vrsqrt.f32 %v533_v14  ;;  %v527_v17 = vmul.f32 0.03125, %v511_v16  ;;  %v508_v18 = vpop.xlane.xlu0 %507 }
 0x21e   : > { %1482 = vrsqrt.f32 %v532_v15  ;;  %v526_v19 = vmul.f32 0.03125, %v508_v18 }
 0x21f   : > { %v535_v20 = vadd.f32 1e-05, %v527_v17 }
 0x220   : > { %v534_v21 = vadd.f32 1e-05, %v526_v19  ;;  %v517_v22 = vpop.xlane.xlu1 %516 }
 0x221   : > { %1484 = vrsqrt.f32 %v535_v20  ;;  %v529_v23 = vmul.f32 0.03125, %v517_v22  ;;  %v514_v24 = vpop.xlane.xlu0 %513 }
 0x222   : > { %1486 = vrsqrt.f32 %v534_v21  ;;  %v528_v26 = vmul.f32 0.03125, %v514_v24 }
 0x223   : > { %v537_v27 = vadd.f32 1e-05, %v529_v23 }
 0x224   : > { %v536_v31 = vadd.f32 1e-05, %v528_v26  ;;  %v523_v34 = vpop.xlane.xlu1 %522 }
 0x225   : > { %1488 = vrsqrt.f32 %v537_v27  ;;  %v531_v36 = vmul.f32 0.03125, %v523_v34  ;;  %v520_v37 = vpop.xlane.xlu0 %519 }
 0x226   : > { %1490 = vrsqrt.f32 %v536_v31  ;;  %v530_v39 = vmul.f32 0.03125, %v520_v37 }
 0x227   : > { %v1481_v41 = vpop.eup %1480  ;;  %v539_v43 = vadd.f32 1e-05, %v531_v36 }
 0x228   : > { %v1483_v44 = vpop.eup %1482  ;;  %v549_v45 = vmul.f32 %v1481_v41, %v1643_v32  ;;  %v538_v46 = vadd.f32 1e-05, %v530_v39 }
 0x229   : > { %1492 = vrsqrt.f32 %v539_v43  ;;  %v548_v48 = vmul.f32 %v1483_v44, %v1645_v33 }
 0x22a   : > { %v561_v49 = vmul.f32 %v559_v38, %v549_v45  ;;  %1494 = vrsqrt.f32 %v538_v46 }
 0x22b   : > { %v1485_v51 = vpop.eup %1484  ;;  %v560_v53 = vmul.f32 %v559_v38, %v548_v48 }
 0x22c   : > { %v1487_v54 = vpop.eup %1486  ;;  %v551_v55 = vmul.f32 %v1485_v51, %v1651_v40  ;;  %v1705_v58 = vadd.f32 %v571_v47, %v561_v49 }
 0x22d   : > { %v1702_v56 = vadd.f32 %v571_v47, %v560_v53  ;;  %v550_v57 = vmul.f32 %v1487_v54, %v1654_v42 }
 0x22e   : > { %v563_v32 = vmul.f32 %v559_v38, %v551_v55 }
 0x22f   : > { %v1489_v59 = vpop.eup %1488  ;;  %1397 = vmatprep.mubr.msk.f32.mxu1 %vm450_vm8, %v1702_v56  ;;  %v562_v61 = vmul.f32 %v559_v38, %v550_v57 }
 0x230   : > { %v1491_v33 = vpop.eup %1490  ;;  %1398 = vmatmul.mubr.msk.f32.vlgmr.msra.gmra.mrb[4].mxu1 %vm450_vm8, %v1705_v58  ;;  %v553_v63 = vmul.f32 %v1489_v59, %v1661_v50  ;;  %v1715_v1 = vadd.f32 %v571_v47, %v563_v32 }
 0x231   : > { %v1712_v0 = vadd.f32 %v571_v47, %v562_v61  ;;  %v552_v40 = vmul.f32 %v1491_v33, %v1664_v52 }
 0x232   : > { %v565_v42 = vmul.f32 %v559_v38, %v553_v63 }
 0x233   : > { %v1493_v2 = vpop.eup %1492  ;;  %1400 = vmatprep.mubr.msk.f32.mxu1 %vm450_vm8, %v1712_v0  ;;  %v564_v3 = vmul.f32 %v559_v38, %v552_v40 }
 0x234   : > { %v1495_v4 = vpop.eup %1494  ;;  %1401 = vmatmul.mubr.msk.f32.gmra.mrb[6].mxu1 %vm450_vm8, %v1715_v1  ;;  %v555_v5 = vmul.f32 %v1493_v2, %v1671_v60  ;;  %v1725_v7 = vadd.f32 %v571_v47, %v565_v42  ;;  %v586_v60 = vsub.s32 3, %v1624_v28 }
 0x235   : > { %v1722_v6 = vadd.f32 %v571_v47, %v564_v3  ;;  %v554_v50 = vmul.f32 %v1495_v4, %v1674_v62 }
 0x236   : > { %v567_v52 = vmul.f32 %v559_v38, %v555_v5  ;;  %v587_v62 = vrot.slane %v1630_v30, %v586_v60 }
 0x237   : > { %1403 = vmatprep.mubr.msk.f32.mxu1 %vm450_vm8, %v1722_v6  ;;  %v566_v8 = vmul.f32 %v559_v38, %v554_v50 }
 0x238   : > { %1404 = vmatmul.mubr.msk.f32.gmra.mrb[8].mxu1 %vm450_vm8, %v1725_v7  ;;  %v1733_v10 = vadd.f32 %v571_v47, %v567_v52 }
 0x239   : > { %v1731_v9 = vadd.f32 %v571_v47, %v566_v8 }
 0x23b   : > { %1406 = vmatprep.mubr.msk.f32.mxu1 %vm450_vm8, %v1731_v9 }
 0x23c   : > { %1407 = vmatmul.mubr.msk.f32.gmra.mrb[10].mxu1 %vm450_vm8, %v1733_v10 }
 0x303   : > { %v1399_v11 = vpop.f32.mrb[4].mxu1 }
 0x304   : > { %v684_v12 = vadd.f32 %v1399_v11, %v587_v62  ;;  %v678_v13 = vpop.f32.mrb[5].mxu1 }
 0x305   : > { %v679_v14 = vadd.f32 %v678_v13, %v587_v62 }
 0x306   : > { %v720_v15 = vsel %vm450_vm8, %v684_v12, 0.0 }
 0x307   : > { %721 = vadd.xlane.f32.xlu1 %v720_v15  ;;  %v1402_v16 = vpop.f32.mrb[6].mxu1  ;;  %v717_v17 = vsel %vm450_vm8, %v679_v14, 0.0 }
 0x308   : > { %v694_v18 = vadd.f32 %v1402_v16, %v587_v62  ;;  %718 = vadd.xlane.f32.xlu0 %v717_v17  ;;  %v688_v19 = vpop.f32.mrb[7].mxu1 }
 0x309   : > { %v689_v20 = vadd.f32 %v688_v19, %v587_v62 }
 0x30a   : > { %v726_v21 = vsel %vm450_vm8, %v694_v18, 0.0 }
 0x30b   : > { %727 = vadd.xlane.f32.xlu1 %v726_v21  ;;  %v1405_v22 = vpop.f32.mrb[8].mxu1  ;;  %v723_v23 = vsel %vm450_vm8, %v689_v20, 0.0 }
 0x30c   : > { %v704_v24 = vadd.f32 %v1405_v22, %v587_v62  ;;  %724 = vadd.xlane.f32.xlu0 %v723_v23  ;;  %v698_v25 = vpop.f32.mrb[9].mxu1  ;;  %v917_v22 = vld [vmem:[%s1983_s4] sm:$0xff]  ;;  %v918_v23 = vld [vmem:[%s1983_s4 + $0x8] sm:$0xff] }
 0x30d   : > { %v699_v26 = vadd.f32 %v698_v25, %v587_v62  ;;  %v1443_v25 = vpack.c.bf16 %v918_v23, %v917_v22 }
 0x30e   : > { %v732_v27 = vsel %vm450_vm8, %v704_v24, 0.0 }
 0x30f   : > { %733 = vadd.xlane.f32.xlu1 %v732_v27  ;;  %v1408_v31 = vpop.f32.mrb[10].mxu1  ;;  %v729_v34 = vsel %vm450_vm8, %v699_v26, 0.0  ;;  %1444 = vmatprep.subr.bf16.mxu0 %v1443_v25 }
 0x310   : > { %v714_v35 = vadd.f32 %v1408_v31, %v587_v62  ;;  %730 = vadd.xlane.f32.xlu0 %v729_v34  ;;  %v708_v36 = vpop.f32.mrb[11].mxu1  ;;  %1446 = vmatpush3.bf16.msra.mxu0 %v1443_v25 }
 0x311   : > { %v709_v37 = vadd.f32 %v708_v36, %v587_v62 }
 0x312   : > { %v738_v38 = vsel %vm450_vm8, %v714_v35, 0.0 }
 0x313   : > { %739 = vadd.xlane.f32.xlu1 %v738_v38  ;;  %v735_v39 = vsel %vm450_vm8, %v709_v37, 0.0 }
 0x314   : > { %736 = vadd.xlane.f32.xlu0 %v735_v39 }
 0x394   : > { %v722_v41 = vpop.xlane.xlu1 %721 }
 0x395   : > { %v742_v43 = vmul.f32 0.03125, %v722_v41  ;;  %v719_v44 = vpop.xlane.xlu0 %718 }
 0x396   : > { %v741_v45 = vmul.f32 0.03125, %v719_v44 }
 0x397   : > { %v1749_v46 = vsub.f32 %v684_v12, %v742_v43 }
 0x398   : > { %v1751_v47 = vsub.f32 %v679_v14, %v741_v45  ;;  %v728_v48 = vpop.xlane.xlu1 %727 }
 0x399   : > { %v744_v49 = vmul.f32 0.03125, %v728_v48  ;;  %v725_v51 = vpop.xlane.xlu0 %724  ;;  %v758_v53 = vmul.f32 %v1749_v46, %v1749_v46 }
 0x39a   : > { %v743_v54 = vmul.f32 0.03125, %v725_v51  ;;  %v757_v55 = vmul.f32 %v1751_v47, %v1751_v47 }
 0x39b   : > { %v1757_v57 = vsub.f32 %v694_v18, %v744_v49  ;;  %v768_v32 = vsel %vm450_vm8, %v758_v53, 0.0 }
 0x39c   : > { %v1760_v59 = vsub.f32 %v689_v20, %v743_v54  ;;  %v734_v61 = vpop.xlane.xlu1 %733  ;;  %769 = vadd.xlane.f32.xlu1 %v768_v32  ;;  %v765_v33 = vsel %vm450_vm8, %v757_v55, 0.0  ;;  %v823_v54 = vsub.s32 4, %v1624_v28 }
 0x39d   : > { %v746_v63 = vmul.f32 0.03125, %v734_v61  ;;  %766 = vadd.xlane.f32.xlu0 %v765_v33  ;;  %v731_v40 = vpop.xlane.xlu0 %730  ;;  %v760_v42 = vmul.f32 %v1757_v57, %v1757_v57  ;;  %v835_v61 = vsub.s32 5, %v1624_v28 }
 0x39e   : > { %v745_v2 = vmul.f32 0.03125, %v731_v40  ;;  %v759_v3 = vmul.f32 %v1760_v59, %v1760_v59 }
 0x39f   : > { %v1767_v4 = vsub.f32 %v704_v24, %v746_v63  ;;  %v774_v5 = vsel %vm450_vm8, %v760_v42, 0.0  ;;  %v919_v24 = vld [vmem:[%s1983_s4 + $0x10] sm:$0xff] }
 0x3a0   : > { %v1770_v50 = vsub.f32 %v699_v26, %v745_v2  ;;  %775 = vadd.xlane.f32.xlu1 %v774_v5  ;;  %v740_v52 = vpop.xlane.xlu1 %739  ;;  %v771_v8 = vsel %vm450_vm8, %v759_v3, 0.0  ;;  %v920_v26 = vld [vmem:[%s1983_s4 + $0x18] sm:$0xff]  ;;  %v824_v2 = vrot.slane %v1630_v30, %v823_v54 }
 0x3a1   : > { %v748_v60 = vmul.f32 0.03125, %v740_v52  ;;  %772 = vadd.xlane.f32.xlu0 %v771_v8  ;;  %v737_v62 = vpop.xlane.xlu0 %736  ;;  %v762_v11 = vmul.f32 %v1767_v4, %v1767_v4  ;;  %v1447_v27 = vpack.c.bf16 %v920_v26, %v919_v24 }
 0x3a2   : > { %v747_v12 = vmul.f32 0.03125, %v737_v62  ;;  %v761_v13 = vmul.f32 %v1770_v50, %v1770_v50 }
 0x3a3   : > { %v1777_v14 = vsub.f32 %v714_v35, %v748_v60  ;;  %v780_v15 = vsel %vm450_vm8, %v762_v11, 0.0  ;;  %1448 = vmatprep.subr.bf16.mxu0 %v1447_v27  ;;  %v836_v60 = vrot.slane %v1630_v30, %v835_v61 }
 0x3a4   : > { %v1780_v16 = vsub.f32 %v709_v37, %v747_v12  ;;  %781 = vadd.xlane.f32.xlu1 %v780_v15  ;;  %v777_v17 = vsel %vm450_vm8, %v761_v13, 0.0  ;;  %1450 = vmatpush3.bf16.msra.mxu0 %v1447_v27 }
 0x3a5   : > { %778 = vadd.xlane.f32.xlu0 %v777_v17  ;;  %v764_v18 = vmul.f32 %v1777_v14, %v1777_v14 }
 0x3a6   : > { %v763_v19 = vmul.f32 %v1780_v16, %v1780_v16 }
 0x3a7   : > { %v786_v20 = vsel %vm450_vm8, %v764_v18, 0.0 }
 0x3a8   : > { %787 = vadd.xlane.f32.xlu1 %v786_v20  ;;  %v783_v21 = vsel %vm450_vm8, %v763_v19, 0.0 }
 0x3a9   : > { %784 = vadd.xlane.f32.xlu0 %v783_v21 }
 0x429   : > { %v770_v31 = vpop.xlane.xlu1 %769 }
 0x42a   : > { %v790_v34 = vmul.f32 0.03125, %v770_v31  ;;  %v767_v35 = vpop.xlane.xlu0 %766 }
 0x42b   : > { %v789_v36 = vmul.f32 0.03125, %v767_v35 }
 0x42c   : > { %v798_v37 = vadd.f32 1e-05, %v790_v34 }
 0x42d   : > { %v797_v38 = vadd.f32 1e-05, %v789_v36  ;;  %v776_v39 = vpop.xlane.xlu1 %775 }
 0x42e   : > { %1496 = vrsqrt.f32 %v798_v37  ;;  %v792_v41 = vmul.f32 0.03125, %v776_v39  ;;  %v773_v43 = vpop.xlane.xlu0 %772 }
 0x42f   : > { %1498 = vrsqrt.f32 %v797_v38  ;;  %v791_v44 = vmul.f32 0.03125, %v773_v43 }
 0x430   : > { %v800_v45 = vadd.f32 1e-05, %v792_v41 }
 0x431   : > { %v799_v48 = vadd.f32 1e-05, %v791_v44  ;;  %v782_v49 = vpop.xlane.xlu1 %781 }
 0x432   : > { %1500 = vrsqrt.f32 %v800_v45  ;;  %v794_v51 = vmul.f32 0.03125, %v782_v49  ;;  %v779_v53 = vpop.xlane.xlu0 %778 }
 0x433   : > { %1502 = vrsqrt.f32 %v799_v48  ;;  %v793_v55 = vmul.f32 0.03125, %v779_v53 }
 0x434   : > { %v802_v32 = vadd.f32 1e-05, %v794_v51 }
 0x435   : > { %v801_v33 = vadd.f32 1e-05, %v793_v55  ;;  %v788_v63 = vpop.xlane.xlu1 %787 }
 0x436   : > { %1504 = vrsqrt.f32 %v802_v32  ;;  %v796_v40 = vmul.f32 0.03125, %v788_v63  ;;  %v785_v42 = vpop.xlane.xlu0 %784 }
 0x437   : > { %1506 = vrsqrt.f32 %v801_v33  ;;  %v795_v3 = vmul.f32 0.03125, %v785_v42 }
 0x438   : > { %v1497_v5 = vpop.eup %1496  ;;  %v804_v52 = vadd.f32 1e-05, %v796_v40 }
 0x439   : > { %v1499_v8 = vpop.eup %1498  ;;  %v814_v62 = vmul.f32 %v1497_v5, %v1749_v46  ;;  %v803_v11 = vadd.f32 1e-05, %v795_v3 }
 0x43a   : > { %v813_v12 = vmul.f32 %v1499_v8, %v1751_v47  ;;  %1508 = vrsqrt.f32 %v804_v52 }
 0x43b   : > { %v826_v13 = vmul.f32 %v824_v2, %v814_v62  ;;  %1510 = vrsqrt.f32 %v803_v11 }
 0x43c   : > { %v1501_v15 = vpop.eup %1500  ;;  %v825_v17 = vmul.f32 %v824_v2, %v813_v12 }
 0x43d   : > { %v1503_v18 = vpop.eup %1502  ;;  %v1807_v19 = vadd.f32 %v836_v60, %v826_v13  ;;  %v816_v20 = vmul.f32 %v1501_v15, %v1757_v57 }
 0x43e   : > { %v1810_v21 = vadd.f32 %v836_v60, %v825_v17  ;;  %v815_v22 = vmul.f32 %v1503_v18, %v1760_v59 }
 0x43f   : > { %v854_v23 = vmul.f32 0.044715, %v1807_v19  ;;  %v828_v46 = vmul.f32 %v824_v2, %v816_v20 }
 0x440   : > { %v1505_v24 = vpop.eup %1504  ;;  %v827_v25 = vmul.f32 %v824_v2, %v815_v22  ;;  %v853_v47 = vmul.f32 0.044715, %v1810_v21 }
 0x441   : > { %v1507_v26 = vpop.eup %1506  ;;  %v1815_v27 = vadd.f32 %v836_v60, %v828_v46  ;;  %v818_v31 = vmul.f32 %v1505_v24, %v1767_v4  ;;  %v862_v34 = vmul.f32 %v854_v23, %v1807_v19 }
 0x442   : > { %v1819_v35 = vadd.f32 %v836_v60, %v827_v25  ;;  %v817_v57 = vmul.f32 %v1507_v26, %v1770_v50  ;;  %v861_v59 = vmul.f32 %v853_v47, %v1810_v21 }
 0x443   : > { %v830_v36 = vmul.f32 %v824_v2, %v818_v31  ;;  %v870_v37 = vmul.f32 %v862_v34, %v1807_v19  ;;  %v856_v38 = vmul.f32 0.044715, %v1815_v27 }
 0x444   : > { %v1509_v39 = vpop.eup %1508  ;;  %v829_v41 = vmul.f32 %v824_v2, %v817_v57  ;;  %v869_v43 = vmul.f32 %v861_v59, %v1810_v21  ;;  %v855_v44 = vmul.f32 0.044715, %v1819_v35 }
 0x445   : > { %v1511_v4 = vpop.eup %1510  ;;  %v1827_v45 = vadd.f32 %v836_v60, %v830_v36  ;;  %v820_v48 = vmul.f32 %v1509_v39, %v1777_v14  ;;  %v878_v50 = vadd.f32 %v870_v37, %v1807_v19  ;;  %v864_v49 = vmul.f32 %v856_v38, %v1815_v27 }
 0x446   : > { %v1832_v51 = vadd.f32 %v836_v60, %v829_v41  ;;  %v819_v53 = vmul.f32 %v1511_v4, %v1780_v16  ;;  %v877_v54 = vadd.f32 %v869_v43, %v1810_v21  ;;  %v863_v55 = vmul.f32 %v855_v44, %v1819_v35 }
 0x447   : > { %v832_v32 = vmul.f32 %v824_v2, %v820_v48  ;;  %v886_v61 = vmul.f32 0.7978846, %v878_v50  ;;  %v872_v33 = vmul.f32 %v864_v49, %v1815_v27  ;;  %v858_v8 = vmul.f32 0.044715, %v1827_v45 }
 0x448   : > { %v831_v63 = vmul.f32 %v824_v2, %v819_v53  ;;  %v885_v40 = vmul.f32 0.7978846, %v877_v54  ;;  %v871_v14 = vmul.f32 %v863_v55, %v1819_v35  ;;  %v857_v5 = vmul.f32 0.044715, %v1832_v51 }
 0x449   : > { %v1839_v42 = vadd.f32 %v836_v60, %v832_v32  ;;  %1512 = vtanh.f32 %v886_v61  ;;  %v880_v3 = vadd.f32 %v872_v33, %v1815_v27  ;;  %v866_v13 = vmul.f32 %v858_v8, %v1827_v45 }
 0x44a   : > { %v843_v16 = vadd.f32 %v836_v60, %v831_v63  ;;  %1514 = vtanh.f32 %v885_v40  ;;  %v879_v52 = vadd.f32 %v871_v14, %v1819_v35  ;;  %v865_v11 = vmul.f32 %v857_v5, %v1832_v51 }
 0x44b   : > { %v888_v62 = vmul.f32 0.7978846, %v880_v3  ;;  %v860_v2 = vmul.f32 0.044715, %v1839_v42  ;;  %v874_v60 = vmul.f32 %v866_v13, %v1827_v45  ;;  %v845_v38 = vmul.f32 0.5, %v1810_v21 }
 0x44c   : > { %v887_v12 = vmul.f32 0.7978846, %v879_v52  ;;  %v859_v15 = vmul.f32 0.044715, %v843_v16  ;;  %v873_v17 = vmul.f32 %v865_v11, %v1832_v51  ;;  %v846_v41 = vmul.f32 0.5, %v1807_v19 }
 0x44d   : > { %1516 = vtanh.f32 %v888_v62  ;;  %v868_v18 = vmul.f32 %v860_v2, %v1839_v42  ;;  %v882_v46 = vadd.f32 %v874_v60, %v1827_v45  ;;  %v847_v49 = vmul.f32 0.5, %v1819_v35 }
 0x44e   : > { %1518 = vtanh.f32 %v887_v12  ;;  %v867_v20 = vmul.f32 %v859_v15, %v843_v16  ;;  %v881_v22 = vadd.f32 %v873_v17, %v1832_v51  ;;  %v848_v54 = vmul.f32 0.5, %v1815_v27 }
 0x44f   : > { %v876_v23 = vmul.f32 %v868_v18, %v1839_v42  ;;  %v890_v26 = vmul.f32 0.7978846, %v882_v46  ;;  %v849_v61 = vmul.f32 0.5, %v1832_v51  ;;  %v850_v40 = vmul.f32 0.5, %v1827_v45 }
 0x450   : > { %v875_v24 = vmul.f32 %v867_v20, %v843_v16  ;;  %v889_v25 = vmul.f32 0.7978846, %v881_v22  ;;  %v851_v52 = vmul.f32 0.5, %v843_v16  ;;  %v852_v11 = vmul.f32 0.5, %v1839_v42 }
 0x451   : > { %v884_v47 = vadd.f32 %v876_v23, %v1839_v42  ;;  %v923_v45 = vsub.s32 6, %v1624_v28 }
 0x452   : > { %v883_v31 = vadd.f32 %v875_v24, %v843_v16  ;;  %1520 = vtanh.f32 %v889_v25 }
 0x453   : > { %v1513_v34 = vpop.eup %1512  ;;  %v892_v57 = vmul.f32 0.7978846, %v884_v47  ;;  %1522 = vtanh.f32 %v890_v26  ;;  %v924_v2 = vrot.slane %v1630_v30, %v923_v45 }
 0x454   : > { %v1515_v59 = vpop.eup %1514  ;;  %v902_v36 = vadd.f32 1.0, %v1513_v34  ;;  %v891_v37 = vmul.f32 0.7978846, %v883_v31 }
 0x455   : > { %v901_v39 = vadd.f32 1.0, %v1515_v59  ;;  %1524 = vtanh.f32 %v892_v57 }
 0x456   : > { %1526 = vtanh.f32 %v891_v37  ;;  %v910_v48 = vmul.f32 %v902_v36, %v846_v41 }
 0x457   : > { %v1517_v43 = vpop.eup %1516  ;;  %v909_v44 = vmul.f32 %v901_v39, %v845_v38 }
 0x458   : > { %v1519_v4 = vpop.eup %1518  ;;  %v904_v50 = vadd.f32 1.0, %v1517_v43 }
 0x459   : > { %1417 = vmatprep.mubr.msk.f32.mxu0 %vm450_vm8, %v909_v44  ;;  %v903_v53 = vadd.f32 1.0, %v1519_v4 }
 0x45a   : > { %1418 = vmatmul.mubr.msk.f32.vlgmr.msra.gmra.mrb[4].mxu0 %vm450_vm8, %v910_v48  ;;  %v912_v55 = vmul.f32 %v904_v50, %v848_v54 }
 0x45b   : > { %v911_v21 = vmul.f32 %v903_v53, %v847_v49 }
 0x45c   : > { %v1521_v32 = vpop.eup %1520 }
 0x45d   : > { %1420 = vmatprep.mubr.msk.f32.mxu0 %vm450_vm8, %v911_v21  ;;  %v1523_v19 = vpop.eup %1522  ;;  %v905_v33 = vadd.f32 1.0, %v1521_v32 }
 0x45e   : > { %1421 = vmatmul.mubr.msk.f32.gmra.mrb[6].mxu0 %vm450_vm8, %v912_v55  ;;  %v906_v35 = vadd.f32 1.0, %v1523_v19 }
 0x45f   : > { %v1525_v63 = vpop.eup %1524  ;;  %v913_v3 = vmul.f32 %v905_v33, %v849_v61 }
 0x460   : > { %v1527_v14 = vpop.eup %1526  ;;  %v914_v5 = vmul.f32 %v906_v35, %v850_v40  ;;  %v908_v8 = vadd.f32 1.0, %v1525_v63 }
 0x461   : > { %v907_v27 = vadd.f32 1.0, %v1527_v14  ;;  %1423 = vmatprep.mubr.msk.f32.mxu0 %vm450_vm8, %v913_v3 }
 0x462   : > { %1424 = vmatmul.mubr.msk.f32.gmra.mrb[8].mxu0 %vm450_vm8, %v914_v5  ;;  %v916_v51 = vmul.f32 %v908_v8, %v852_v11 }
 0x463   : > { %v915_v62 = vmul.f32 %v907_v27, %v851_v52 }
 0x465   : > { %1426 = vmatprep.mubr.msk.f32.mxu0 %vm450_vm8, %v915_v62 }
 0x466   : > { %1427 = vmatmul.mubr.msk.f32.gmra.mrb[10].mxu0 %vm450_vm8, %v916_v51 }
 0x52d   : > { %v1419_v12 = vpop.f32.mrb[4].mxu0 }
 0x52e   : > { %v1021_v16 = vadd.f32 %v1419_v12, %v924_v2  ;;  %v1015_v13 = vpop.f32.mrb[5].mxu0 }
 0x52f   : > { %v1016_v15 = vadd.f32 %v1015_v13, %v924_v2 }
 0x530   : > { %v1057_v17 = vsel %vm450_vm8, %v1021_v16, 0.0 }
 0x531   : > { %1058 = vadd.xlane.f32.xlu1 %v1057_v17  ;;  %v1422_v18 = vpop.f32.mrb[6].mxu0  ;;  %v1054_v60 = vsel %vm450_vm8, %v1016_v15, 0.0 }
 0x532   : > { %v1031_v42 = vadd.f32 %v1422_v18, %v924_v2  ;;  %1055 = vadd.xlane.f32.xlu0 %v1054_v60  ;;  %v1025_v20 = vpop.f32.mrb[7].mxu0 }
 0x533   : > { %v1026_v22 = vadd.f32 %v1025_v20, %v924_v2 }
 0x534   : > { %v1063_v23 = vsel %vm450_vm8, %v1031_v42, 0.0 }
 0x535   : > { %1064 = vadd.xlane.f32.xlu1 %v1063_v23  ;;  %v1060_v46 = vsel %vm450_vm8, %v1026_v22, 0.0  ;;  %v1425_v30 = vpop.f32.mrb[8].mxu0 }
 0x536   : > { %1061 = vadd.xlane.f32.xlu0 %v1060_v46  ;;  %v1041_v24 = vadd.f32 %v1425_v30, %v924_v2  ;;  %v1035_v25 = vpop.f32.mrb[9].mxu0 }
 0x537   : > { %v1036_v47 = vadd.f32 %v1035_v25, %v924_v2 }
 0x538   : > { %v1069_v26 = vsel %vm450_vm8, %v1041_v24, 0.0 }
 0x539   : > { %1070 = vadd.xlane.f32.xlu1 %v1069_v26  ;;  %v1428_v31 = vpop.f32.mrb[10].mxu0  ;;  %v1066_v34 = vsel %vm450_vm8, %v1036_v47, 0.0 }
 0x53a   : > { %v1051_v57 = vadd.f32 %v1428_v31, %v924_v2  ;;  %1067 = vadd.xlane.f32.xlu0 %v1066_v34  ;;  %v1045_v59 = vpop.f32.mrb[11].mxu0 }
 0x53b   : > { %v1046_v36 = vadd.f32 %v1045_v59, %v924_v2 }
 0x53c   : > { %v1075_v37 = vsel %vm450_vm8, %v1051_v57, 0.0 }
 0x53d   : > { %1076 = vadd.xlane.f32.xlu1 %v1075_v37  ;;  %v1072_v38 = vsel %vm450_vm8, %v1046_v36, 0.0 }
 0x53e   : > { %1073 = vadd.xlane.f32.xlu0 %v1072_v38 }
 0x5be   : > { %v1059_v39 = vpop.xlane.xlu1 %1058 }
 0x5bf   : > { %v1079_v41 = vmul.f32 0.03125, %v1059_v39  ;;  %v1056_v43 = vpop.xlane.xlu0 %1055 }
 0x5c0   : > { %v1078_v44 = vmul.f32 0.03125, %v1056_v43 }
 0x5c1   : > { %v1880_v4 = vsub.f32 %v1021_v16, %v1079_v41  ;;  %v1160_v41 = vsub.s32 7, %v1624_v28 }
 0x5c2   : > { %v1882_v48 = vsub.f32 %v1016_v15, %v1078_v44  ;;  %v1065_v50 = vpop.xlane.xlu1 %1064 }
 0x5c3   : > { %v1081_v49 = vmul.f32 0.03125, %v1065_v50  ;;  %v1062_v53 = vpop.xlane.xlu0 %1061  ;;  %v1095_v54 = vmul.f32 %v1880_v4, %v1880_v4 }
 0x5c4   : > { %v1080_v21 = vmul.f32 0.03125, %v1062_v53  ;;  %v1094_v55 = vmul.f32 %v1882_v48, %v1882_v48  ;;  %v237_v53 = vld [vmem:[%s1981_s2 + $0x8] sm:$0xff] }
 0x5c5   : > { %v1888_v32 = vsub.f32 %v1031_v42, %v1081_v49  ;;  %v1105_v19 = vsel %vm450_vm8, %v1095_v54, 0.0 }
 0x5c6   : > { %v1891_v61 = vsub.f32 %v1026_v22, %v1080_v21  ;;  %1106 = vadd.xlane.f32.xlu1 %v1105_v19  ;;  %v1102_v33 = vsel %vm450_vm8, %v1094_v55, 0.0  ;;  %v1071_v63 = vpop.xlane.xlu1 %1070  ;;  %v1544_v55 = vld [vmem:[%s1981_s2] sm:$0xff] }
 0x5c7   : > { %1103 = vadd.xlane.f32.xlu0 %v1102_v33  ;;  %v1097_v40 = vmul.f32 %v1888_v32, %v1888_v32  ;;  %v1083_v35 = vmul.f32 0.03125, %v1071_v63  ;;  %v1068_v14 = vpop.xlane.xlu0 %1067  ;;  %v1161_v19 = vrot.slane %v1544_v55, %v1160_v41 }
 0x5c8   : > { %v1096_v3 = vmul.f32 %v1891_v61, %v1891_v61  ;;  %v1082_v5 = vmul.f32 0.03125, %v1068_v14 }
 0x5c9   : > { %v1111_v52 = vsel %vm450_vm8, %v1097_v40, 0.0  ;;  %v1899_v27 = vsub.f32 %v1041_v24, %v1083_v35 }
 0x5ca   : > { %1112 = vadd.xlane.f32.xlu1 %v1111_v52  ;;  %v1108_v8 = vsel %vm450_vm8, %v1096_v3, 0.0  ;;  %v1902_v62 = vsub.f32 %v1036_v47, %v1082_v5  ;;  %v1077_v11 = vpop.xlane.xlu1 %1076  ;;  %v1173_v3 = vrot.slane %v237_v53, %v299_v29 }
 0x5cb   : > { %1109 = vadd.xlane.f32.xlu0 %v1108_v8  ;;  %v1085_v51 = vmul.f32 0.03125, %v1077_v11  ;;  %v1074_v45 = vpop.xlane.xlu0 %1073  ;;  %v1099_v2 = vmul.f32 %v1899_v27, %v1899_v27 }
 0x5cc   : > { %v1084_v12 = vmul.f32 0.03125, %v1074_v45  ;;  %v1098_v16 = vmul.f32 %v1902_v62, %v1902_v62 }
 0x5cd   : > { %v1908_v13 = vsub.f32 %v1051_v57, %v1085_v51  ;;  %v1117_v15 = vsel %vm450_vm8, %v1099_v2, 0.0 }
 0x5ce   : > { %v1911_v17 = vsub.f32 %v1046_v36, %v1084_v12  ;;  %1118 = vadd.xlane.f32.xlu1 %v1117_v15  ;;  %v1114_v18 = vsel %vm450_vm8, %v1098_v16, 0.0 }
 0x5cf   : > { %1115 = vadd.xlane.f32.xlu0 %v1114_v18  ;;  %v1101_v60 = vmul.f32 %v1908_v13, %v1908_v13 }
 0x5d0   : > { %v1100_v42 = vmul.f32 %v1911_v17, %v1911_v17 }
 0x5d1   : > { %v1123_v20 = vsel %vm450_vm8, %v1101_v60, 0.0 }
 0x5d2   : > { %1124 = vadd.xlane.f32.xlu1 %v1123_v20  ;;  %v1120_v22 = vsel %vm450_vm8, %v1100_v42, 0.0 }
 0x5d3   : > { %1121 = vadd.xlane.f32.xlu0 %v1120_v22 }
 0x653   : > { %v1107_v23 = vpop.xlane.xlu1 %1106 }
 0x654   : > { %v1127_v46 = vmul.f32 0.03125, %v1107_v23  ;;  %v1104_v30 = vpop.xlane.xlu0 %1103 }
 0x655   : > { %v1126_v24 = vmul.f32 0.03125, %v1104_v30 }
 0x656   : > { %v1135_v25 = vadd.f32 1e-05, %v1127_v46 }
 0x657   : > { %v1134_v47 = vadd.f32 1e-05, %v1126_v24  ;;  %v1113_v26 = vpop.xlane.xlu1 %1112 }
 0x658   : > { %1528 = vrsqrt.f32 %v1135_v25  ;;  %v1129_v31 = vmul.f32 0.03125, %v1113_v26  ;;  %v1110_v34 = vpop.xlane.xlu0 %1109 }
 0x659   : > { %1530 = vrsqrt.f32 %v1134_v47  ;;  %v1128_v57 = vmul.f32 0.03125, %v1110_v34 }
 0x65a   : > { %v1137_v59 = vadd.f32 1e-05, %v1129_v31 }
 0x65b   : > { %v1136_v36 = vadd.f32 1e-05, %v1128_v57  ;;  %v1119_v37 = vpop.xlane.xlu1 %1118 }
 0x65c   : > { %1532 = vrsqrt.f32 %v1137_v59  ;;  %v1131_v38 = vmul.f32 0.03125, %v1119_v37  ;;  %v1116_v39 = vpop.xlane.xlu0 %1115 }
 0x65d   : > { %1534 = vrsqrt.f32 %v1136_v36  ;;  %v1130_v43 = vmul.f32 0.03125, %v1116_v39 }
 0x65e   : > { %v1139_v44 = vadd.f32 1e-05, %v1131_v38 }
 0x65f   : > { %v1138_v50 = vadd.f32 1e-05, %v1130_v43  ;;  %v1125_v49 = vpop.xlane.xlu1 %1124 }
 0x660   : > { %1536 = vrsqrt.f32 %v1139_v44  ;;  %v1133_v54 = vmul.f32 0.03125, %v1125_v49  ;;  %v1122_v21 = vpop.xlane.xlu0 %1121 }
 0x661   : > { %1538 = vrsqrt.f32 %v1138_v50  ;;  %v1132_v63 = vmul.f32 0.03125, %v1122_v21 }
 0x662   : > { %v1529_v33 = vpop.eup %1528  ;;  %v1141_v35 = vadd.f32 1e-05, %v1133_v54 }
 0x663   : > { %v1531_v40 = vpop.eup %1530  ;;  %v1151_v14 = vmul.f32 %v1529_v33, %v1880_v4  ;;  %v1140_v5 = vadd.f32 1e-05, %v1132_v63 }
 0x664   : > { %v1150_v52 = vmul.f32 %v1531_v40, %v1882_v48  ;;  %1540 = vrsqrt.f32 %v1141_v35 }
 0x665   : > { %v1163_v8 = vmul.f32 %v1161_v19, %v1151_v14  ;;  %1542 = vrsqrt.f32 %v1140_v5 }
 0x666   : > { %v1533_v11 = vpop.eup %1532  ;;  %v1162_v51 = vmul.f32 %v1161_v19, %v1150_v52 }
 0x667   : > { %v1535_v45 = vpop.eup %1534  ;;  %v1175_v2 = vadd.f32 %v1173_v3, %v1163_v8  ;;  %v1153_v12 = vmul.f32 %v1533_v11, %v1888_v32 }
 0x668   : > { %v1174_v16 = vadd.f32 %v1173_v3, %v1162_v51  ;;  %v1152_v15 = vmul.f32 %v1535_v45, %v1891_v61 }
 0x669   : > { %1192 = vrot.lane.b32.xlu1 %v1175_v2, %s1555_s29  ;;  %v1165_v4 = vmul.f32 %v1161_v19, %v1153_v12 }
 0x66a   : > { %1190 = vrot.lane.b32.xlu0 %v1174_v16, %s1555_s29  ;;  %v1537_v28 = vpop.eup %1536  ;;  %v1164_v18 = vmul.f32 %v1161_v19, %v1152_v15 }
 0x66b   : > { %v1177_v29 = vadd.f32 %v1173_v3, %v1165_v4  ;;  %v1539_v48 = vpop.eup %1538  ;;  %v1155_v60 = vmul.f32 %v1537_v28, %v1899_v27 }
 0x66c   : > { %v1154_v42 = vmul.f32 %v1539_v48, %v1902_v62  ;;  %v1176_v22 = vadd.f32 %v1173_v3, %v1164_v18 }
 0x66d   : > { %1196 = vrot.lane.b32.xlu1 %v1177_v29, %s1555_s29  ;;  %v1167_v32 = vmul.f32 %v1161_v19, %v1155_v60 }
 0x66e   : > { %v1541_v20 = vpop.eup %1540  ;;  %v1166_v23 = vmul.f32 %v1161_v19, %v1154_v42 }
 0x66f   : > { %v1543_v46 = vpop.eup %1542  ;;  %v1157_v61 = vmul.f32 %v1541_v20, %v1908_v13  ;;  %v1179_v25 = vadd.f32 %v1173_v3, %v1167_v32 }
 0x670   : > { %v1178_v30 = vadd.f32 %v1173_v3, %v1166_v23  ;;  %v1156_v24 = vmul.f32 %v1543_v46, %v1911_v17 }
 0x671   : > { %1194 = vrot.lane.b32.xlu1 %v1176_v22, %s1555_s29  ;;  %v1169_v26 = vmul.f32 %v1161_v19, %v1157_v61 }
 0x672   : > { %1198 = vrot.lane.b32.xlu0 %v1178_v30, %s1555_s29  ;;  %v1168_v47 = vmul.f32 %v1161_v19, %v1156_v24 }
 0x673   : > { %v1181_v62 = vadd.f32 %v1173_v3, %v1169_v26 }
 0x674   : > { %v1180_v27 = vadd.f32 %v1173_v3, %v1168_v47 }
 0x675   : > { %1200 = vrot.lane.b32.xlu1 %v1179_v25, %s1555_s29 }
 0x676   : > { %1202 = vrot.lane.b32.xlu0 %v1180_v27, %s1555_s29 }
 0x679   : > { %1204 = vrot.lane.b32.xlu1 %v1181_v62, %s1555_s29 }
 0x6db   : > { %v1193_v13 = vpop.permute.xlu1 %1192 }
 0x6dc   : > { %v1215_v17 = vsel %vm450_vm8, %v1705_v58, %v1193_v13  ;;  %v1191_v31 = vpop.permute.xlu0 %1190 }
 0x6dd   : > { %v1224_v34 = vsel %vm1222_vm13, %v1215_v17, 0.0  ;;  %v1214_v57 = vsel %vm450_vm8, %v1702_v56, %v1191_v31 }
 0x6de   : > { %1232 = vst [vmem:[%s1942_s7 + $0x8] sm:$0xff] %v1224_v34  ;;  %v1223_v59 = vsel %vm1222_vm13, %v1214_v57, 0.0 }
 0x6df   : > { %1231 = vst [vmem:[%s1942_s7] sm:$0xff] %v1223_v59  ;;  %v1197_v36 = vpop.permute.xlu1 %1196 }
 0x6e0   : > { %v1217_v37 = vsel %vm450_vm8, %v1715_v1, %v1197_v36 }
 0x6e1   : > { %v1226_v38 = vsel %vm1222_vm13, %v1217_v37, 0.0 }
 0x6e2   : > { %1234 = vst [vmem:[%s1942_s7 + $0x18] sm:$0xff] %v1226_v38 }
 0x6e3   : > { %v1195_v58 = vpop.permute.xlu1 %1194 }
 0x6e4   : > { %v1216_v39 = vsel %vm450_vm8, %v1712_v0, %v1195_v58  ;;  %v1199_v41 = vpop.permute.xlu0 %1198 }
 0x6e5   : > { %v1225_v56 = vsel %vm1222_vm13, %v1216_v39, 0.0  ;;  %v1218_v43 = vsel %vm450_vm8, %v1722_v6, %v1199_v41 }
 0x6e6   : > { %1233 = vst [vmem:[%s1942_s7 + $0x10] sm:$0xff] %v1225_v56  ;;  %v1227_v44 = vsel %vm1222_vm13, %v1218_v43, 0.0 }
 0x6e7   : > { %v1201_v50 = vpop.permute.xlu1 %1200  ;;  %1235 = vst [vmem:[%s1942_s7 + $0x20] sm:$0xff] %v1227_v44 }
 0x6e8   : > { %v1219_v1 = vsel %vm450_vm8, %v1725_v7, %v1201_v50  ;;  %v1203_v53 = vpop.permute.xlu0 %1202 }
 0x6e9   : > { %v1228_v49 = vsel %vm1222_vm13, %v1219_v1, 0.0  ;;  %v1220_v0 = vsel %vm450_vm8, %v1731_v9, %v1203_v53 }
 0x6ea   : > { %1236 = vst [vmem:[%s1942_s7 + $0x28] sm:$0xff] %v1228_v49  ;;  %v1229_v54 = vsel %vm1222_vm13, %v1220_v0, 0.0 }
 0x6eb   : > { %v1205_v21 = vpop.permute.xlu1 %1204  ;;  %1237 = vst [vmem:[%s1942_s7 + $0x30] sm:$0xff] %v1229_v54 }
 0x6ec   : > { %v1221_v6 = vsel %vm450_vm8, %v1733_v10, %v1205_v21 }
 0x6ed   : > { %v1230_v55 = vsel %vm1222_vm13, %v1221_v6, 0.0 }
 0x6ee   : > { %1238 = vst [vmem:[%s1942_s7 + $0x38] sm:$0xff] %v1230_v55 }
 0x6ef PF: > { %s15_s18 = sadd.s32 1, %s1551_s18  }
 0x6f0   : > { %p12_p4 = scmp.ge.s32.totalorder %s15_s18, 4  }
 0x6f2   :  { %14 = sbr.rel (!%p12_p4) target bundleno = 1 (0x1), region = 70 }

// kernel: _lambda_.3
= control target key start
LH: loop header
LB: loop body
LE: loop exit
PB: predicated region body
PF: predicated region fallthrough
CT: control target
= control target key end

     0   :  { %s2353_s29 = smov 0   ;;  %s2776_s0 = inlined_call_operand.vmem [shape: f32[128,128], index: 0, kind: input, shape index: {}, may-alias: {0,1}]   ;;  %s2777_s1 = inlined_call_operand.vmem [shape: f32[128,128], index: 1, kind: input, shape index: {}, may-alias: {0,1}]   ;;  %s2778_s2 = inlined_call_operand.vmem [shape: f32[32,128], index: 2, kind: input, shape index: {}]   ;;  %s2779_s3 = inlined_call_operand.vmem [shape: f32[128,12], index: 3, kind: input, shape index: {}]   ;;  %s2780_s4 = inlined_call_operand.vmem [shape: f32[128,32], index: 4, kind: input, shape index: {}]   ;;  %s2781_s5 = inlined_call_operand.vmem [shape: f32[12,16], index: 5, kind: input, shape index: {}]   ;;  %s2782_s6 = inlined_call_operand.vmem [shape: f32[32,40], index: 6, kind: input, shape index: {}]   ;;  %s2783_s7 = inlined_call_operand.vmem [shape: f32[128,40], index: 7, kind: input, shape index: {}]   ;;  %s2784_s8 = inlined_call_operand.vmem [shape: f32[16,40], index: 8, kind: input, shape index: {}]   ;;  %s2785_s9 = inlined_call_operand.vmem [shape: f32[128,24], index: 9, kind: input, shape index: {}]   ;;  %s2786_s10 = inlined_call_operand.vmem [shape: f32[16,24], index: 10, kind: input, shape index: {}]   ;;  %s2787_s11 = inlined_call_operand.vmem [shape: f32[40,128], index: 11, kind: input, shape index: {}]   ;;  %s2788_s12 = inlined_call_operand.vmem [shape: f32[24,128], index: 12, kind: input, shape index: {}]   ;;  %s2789_s13 = inlined_call_operand.vmem [shape: f32[16,128], index: 13, kind: input, shape index: {}]   ;;  %s2790_s14 = inlined_call_operand.vmem [shape: f32[32,128], index: 14, kind: output, shape index: {}]  }
   0x1 LB: > { %s1734_s30 = sadd.s32 4294967295, %s2275_s29   ;;  %p1738_p0 = scmp.ge.s32.totalorder %s2275_s29, 1  ;;  %s2275_s29 = sphi %s2353_s29, %s24_s29  }
   0x2   : > { %p435_p1 = scmp.lt.s32.totalorder %s2275_s29, 3 }
   0x4   : > { %p436_p2 = pnand %p1738_p0, %p435_p1 }
   0x5   : > { %v521_v0 = vld [vmem:[%s2777_s1] sm:$0xff] (!%p436_p2)  ;;  %v522_v1 = vld [vmem:[%s2777_s1 + $0x8] sm:$0xff] (!%p436_p2)  ;;  %v523_v2 = vld [vmem:[%s2777_s1 + $0x10] sm:$0xff] (!%p436_p2)  ;;  %s2370_s21 = sshll.u32 (!%p436_p2), %s1734_s30, 1  ;;  %vm782_vm0 = vcmask (!%p436_p2), 1043456   ;;  %vm2277_vm1 = vmmov (!%p436_p2), 1   ;;  %v630_v55 = vlaneseq (!%p436_p2) }
   0x6   : > { %439 = sbr.rel (%p436_p2) target bundleno = 1596 (0x63c), region = 76  ;;  %v2058_v3 = vpack.c.bf16 (!%p436_p2), %v522_v1, %v521_v0  ;;  %v524_v4 = vld [vmem:[%s2777_s1 + $0x18] sm:$0xff] (!%p436_p2)  ;;  %p498_p3 = scmp.lt.s32.totalorder (!%p436_p2), %s2370_s21, 3  ;;  %v525_v6 = vld [vmem:[%s2777_s1 + $0x20] sm:$0xff] (!%p436_p2)  ;;  %v526_v7 = vld [vmem:[%s2777_s1 + $0x28] sm:$0xff] (!%p436_p2)  ;;  %vm775_vm3 = vcmask (!%p436_p2), 97280  }
   0x7   : > { %v2062_v5 = vpack.c.bf16 (!%p436_p2), %v524_v4, %v523_v2  ;;  %v2066_v8 = vpack.c.bf16 (!%p436_p2), %v526_v7, %v525_v6  ;;  %v527_v9 = vld [vmem:[%s2777_s1 + $0x30] sm:$0xff] (!%p436_p2)  ;;  %v528_v10 = vld [vmem:[%s2777_s1 + $0x38] sm:$0xff] (!%p436_p2)  ;;  %v614_v11 = vld [vmem:[%s2780_s4] sm:$0xff] (!%p436_p2)  ;;  %p492_p4 = scmp.lt.s32.totalorder (!%p436_p2), %s2370_s21, 15  ;;  %v2489_v56 = vshrl.u32 (!%p436_p2), %v630_v55, 7  ;;  %vm861_vm4 = vcmask (!%p436_p2), 130048  }
   0x8   : > { %2059 = vmatprep.subr.bf16.mxu0 (!%p436_p2), %v2058_v3  ;;  %v615_v12 = vld [vmem:[%s2780_s4 + $0x8] sm:$0xff] (!%p436_p2)  ;;  %v616_v15 = vld [vmem:[%s2780_s4 + $0x10] sm:$0xff] (!%p436_p2)  ;;  %v617_v16 = vld [vmem:[%s2780_s4 + $0x18] sm:$0xff] (!%p436_p2)  ;;  %v2070_v19 = vpack.c.bf16 (!%p436_p2), %v528_v10, %v527_v9  ;;  %vm727_vm5 = vcmask (!%p436_p2), 261120   ;;  %vm1418_vm6 = vcmask (!%p436_p2), 195584   ;;  %vm1186_vm7 = vcmask (!%p436_p2), 326656  }
   0x9   : > { %2061 = vmatpush3.bf16.msra.mxu0 (!%p436_p2), %v2058_v3  ;;  %v2090_v14 = vpack.c.bf16 (!%p436_p2), %v615_v12, %v614_v11  ;;  %v618_v17 = vld [vmem:[%s2780_s4 + $0x20] sm:$0xff] (!%p436_p2)  ;;  %v619_v18 = vld [vmem:[%s2780_s4 + $0x28] sm:$0xff] (!%p436_p2)  ;;  %v2094_v20 = vpack.c.bf16 (!%p436_p2), %v617_v16, %v616_v15  ;;  %v620_v24 = vld [vmem:[%s2780_s4 + $0x30] sm:$0xff] (!%p436_p2)  ;;  %v773_v57 = vsub.s32 (!%p436_p2), 3, %v2489_v56 }
   0xa   : > { %2063 = vmatprep.subr.bf16.mxu0 (!%p436_p2), %v2062_v5  ;;  %v529_v21 = vld [vmem:[%s2777_s1 + $0x40] sm:$0xff] (!%p436_p2)  ;;  %v530_v22 = vld [vmem:[%s2777_s1 + $0x48] sm:$0xff] (!%p436_p2)  ;;  %v2098_v23 = vpack.c.bf16 (!%p436_p2), %v619_v18, %v618_v17  ;;  %v621_v25 = vld [vmem:[%s2780_s4 + $0x38] sm:$0xff] (!%p436_p2) }
   0xb   : > { %2091 = vmatprep.subr.bf16.mxu1 (!%p436_p2), %v2090_v14  ;;  %v2074_v26 = vpack.c.bf16 (!%p436_p2), %v530_v22, %v529_v21  ;;  %v531_v27 = vld [vmem:[%s2777_s1 + $0x50] sm:$0xff] (!%p436_p2)  ;;  %v532_v28 = vld [vmem:[%s2777_s1 + $0x58] sm:$0xff] (!%p436_p2)  ;;  %v2102_v29 = vpack.c.bf16 (!%p436_p2), %v621_v25, %v620_v24  ;;  %v622_v30 = vld [vmem:[%s2780_s4 + $0x40] sm:$0xff] (!%p436_p2) }
   0xc   : > { %2093 = vmatpush3.bf16.msra.mxu1 (!%p436_p2), %v2090_v14  ;;  %v623_v31 = vld [vmem:[%s2780_s4 + $0x48] sm:$0xff] (!%p436_p2)  ;;  %v2078_v32 = vpack.c.bf16 (!%p436_p2), %v532_v28, %v531_v27  ;;  %v533_v33 = vld [vmem:[%s2777_s1 + $0x60] sm:$0xff] (!%p436_p2)  ;;  %v624_v36 = vld [vmem:[%s2780_s4 + $0x50] sm:$0xff] (!%p436_p2) }
   0xd   : > { %s2383_s28 = scalar_select %p498_p3, %s2370_s21, 3  ;;  %2065 = vmatpush3.bf16.msra.mxu0 %v2062_v5  ;;  %2095 = vmatprep.subr.bf16.mxu1 %v2094_v20  ;;  %v534_v34 = vld [vmem:[%s2777_s1 + $0x68] sm:$0xff]  ;;  %v2106_v35 = vpack.c.bf16 %v623_v31, %v622_v30  ;;  %v625_v37 = vld [vmem:[%s2780_s4 + $0x58] sm:$0xff]  ;;  %v535_v39 = vld [vmem:[%s2777_s1 + $0x70] sm:$0xff] }
   0xe   : > { %2067 = vmatprep.subr.bf16.mxu0 %v2066_v8  ;;  %v2082_v38 = vpack.c.bf16 %v534_v34, %v533_v33  ;;  %v536_v40 = vld [vmem:[%s2777_s1 + $0x78] sm:$0xff]  ;;  %s2792_s21 = smov (!%p492_p4, %s2370_s21), 15  ;;  %v2110_v41 = vpack.c.bf16 %v625_v37, %v624_v36  ;;  %v626_v42 = vld [vmem:[%s2780_s4 + $0x60] sm:$0xff]  ;;  %v627_v43 = vld [vmem:[%s2780_s4 + $0x68] sm:$0xff] }
   0xf   : > { %s1742_s16 = sshll.u32 %s2383_s28, 3  ;;  %v2086_v44 = vpack.c.bf16 %v536_v40, %v535_v39  ;;  %v769_v45 = vld [vmem:[%s2781_s5] sm:$0xff]  ;;  %v770_v46 = vld [vmem:[%s2781_s5 + $0x8] sm:$0xf]  ;;  %s1740_s27 = sshll.u32 %s2792_s21, 3  ;;  %v2114_v47 = vpack.c.bf16 %v627_v43, %v626_v42  ;;  %vm2123_vm2 = vmpackc.low %vm782_vm0, %vm2277_vm1 }
  0x10   : > { %s2397_s22 = scalar_lea.vmem %s2778_s2, %s1742_s16  ;;  %2097 = vmatpush3.bf16.msra.mxu1 %v2094_v20  ;;  %v2122_v48 = vpack.c.bf16 %v770_v46, %v769_v45  ;;  %s507_s17 = scalar_lea.vmem %s2779_s3, %s1740_s27  ;;  %v628_v52 = vld [vmem:[%s2780_s4 + $0x70] sm:$0xff]  ;;  %v629_v53 = vld [vmem:[%s2780_s4 + $0x78] sm:$0xff]  ;;  %v2502_v59 = vld [vmem:[%s2789_s13] sm:$0xff] }
  0x11   : > { %v519_v13 = vld [vmem:[%s2397_s22] sm:$0xff]  ;;  %2069 = vmatpush3.bf16.msra.mxu0 %v2066_v8  ;;  %2099 = vmatprep.subr.bf16.mxu1 %v2098_v23  ;;  %v520_v49 = vld [vmem:[%s2397_s22 + $0x8] sm:$0xff]  ;;  %v2118_v54 = vpack.c.bf16 %v629_v53, %v628_v52  ;;  %s495_s25 = scalar_lea.vmem %s2776_s0, %s1740_s27  ;;  %v774_v0 = vrot.slane %v2502_v59, %v773_v57  ;;  %v891_v53 = vsub.s32 4, %v2489_v56  ;;  %s513_s24 = scalar_lea.vmem %s2790_s14, %s1742_s16 }
  0x12   : > { %1896 = vmatprep.mubr.f32.mxu0 %v519_v13  ;;  %2071 = vmatprep.subr.bf16.mxu0 %v2070_v19  ;;  %v767_v50 = vld [vmem:[%s507_s17] sm:$0xff]  ;;  %v768_v51 = vld [vmem:[%s507_s17 + $0x8] sm:$0xff]  ;;  %v632_v13 = vsub.s32 0, %v2489_v56 }
  0x13   : > { %v2497_v58 = vld [vmem:[%s495_s25] sm:$0xff]  ;;  %v2504_v60 = vld [vmem:[%s495_s25 + $0x8] sm:$0xff]  ;;  %v892_v55 = vrot.slane %v2502_v59, %v891_v53 }
  0x14   : > { %2101 = vmatpush3.bf16.msra.mxu1 %v2098_v23  ;;  %v633_v14 = vrot.slane %v2502_v59, %v632_v13  ;;  %v1261_v45 = vld [vmem:[%s2786_s10 + $0x8] sm:$0xff]  ;;  %v1244_v46 = vld [vmem:[%s2785_s9] sm:$0xff] }
  0x15   : > { %2073 = vmatpush3.bf16.msra.mxu0 %v2070_v19  ;;  %2103 = vmatprep.subr.bf16.mxu1 %v2102_v29 }
  0x16   : > { %2075 = vmatprep.subr.bf16.mxu0 %v2074_v26 }
  0x18   : > { %2105 = vmatpush3.bf16.msra.mxu1 %v2102_v29 }
  0x19   : > { %2077 = vmatpush3.bf16.msra.mxu0 %v2074_v26  ;;  %2107 = vmatprep.subr.bf16.mxu1 %v2106_v35 }
  0x1a   : > { %2079 = vmatprep.subr.bf16.mxu0 %v2078_v32 }
  0x1c   : > { %2109 = vmatpush3.bf16.msra.mxu1 %v2106_v35 }
  0x1d   : > { %2081 = vmatpush3.bf16.msra.mxu0 %v2078_v32  ;;  %2111 = vmatprep.subr.bf16.mxu1 %v2110_v41 }
  0x1e   : > { %2083 = vmatprep.subr.bf16.mxu0 %v2082_v38 }
  0x20   : > { %2113 = vmatpush3.bf16.msra.mxu1 %v2110_v41 }
  0x21   : > { %2085 = vmatpush3.bf16.msra.mxu0 %v2082_v38  ;;  %2115 = vmatprep.subr.bf16.mxu1 %v2114_v47 }
  0x22   : > { %2087 = vmatprep.subr.bf16.mxu0 %v2086_v44 }
  0x24   : > { %2117 = vmatpush3.bf16.msra.mxu1 %v2114_v47 }
  0x25   : > { %2089 = vmatpush3.bf16.msra.mxu0 %v2086_v44  ;;  %2119 = vmatprep.subr.bf16.mxu1 %v2118_v54  ;;  %v1260_v44 = vld [vmem:[%s2786_s10] sm:$0xff] }
  0x26   : > { %2124 = vmatprep.subr.msk.bf16.mxu0 %vm2123_vm2, %v2122_v48  ;;  %v2172_v47 = vpack.c.bf16 %v1261_v45, %v1260_v44  ;;  %v934_v44 = vld [vmem:[%s2783_s7 + $0x58] sm:$0xff] }
  0x28   : > { %1897 = vmatmul.mubr.f32.vlgmr.msra.gmra.mrb[0].mxu0 %v520_v49  ;;  %2121 = vmatpush3.bf16.msra.mxu1 %v2118_v54  ;;  %v897_v54 = vsub.s32 5, %v2489_v56 }
  0x29   : > { %2127 = vmatpush3.bf16.msk.msra.mxu0 %vm2123_vm2, %v2122_v48  ;;  %1938 = vmatprep.mubr.msk.f32.mxu0 %vm775_vm3, %v767_v50  ;;  %v1245_v48 = vld [vmem:[%s2785_s9 + $0x8] sm:$0xff] }
  0x2a   : > { %v2544_v49 = vpack.c.bf16 %v1245_v48, %v1244_v46  ;;  %2173 = vmatprep.subr.bf16.mxu0 %v2172_v47  ;;  %v935_v48 = vld [vmem:[%s2783_s7 + $0x60] sm:$0xff] }
  0x2c   : > { %1939 = vmatmul.mubr.msk.f32.vlgmr.msra.gmra.mrb[2].mxu0 %vm775_vm3, %v768_v51 }
  0x2d   : > { %2175 = vmatpush3.bf16.msra.mxu0 %v2172_v47 }
  0x2e   : > { %2177 = vmatprep.subr.bf16.mxu0 %v2544_v49 }
  0xfb   : > { %v1898_v61 = vpop.f32.mrb[0].mxu0 }
  0xfc   : > { %v603_v62 = vpop.f32.mrb[1].mxu0  ;;  %v613_v1 = vadd.f32 %v1898_v61, %v2504_v60 }
  0xfd   : > { %v612_v63 = vadd.f32 %v603_v62, %v2497_v58  ;;  %v898_v62 = vrot.slane %v2502_v59, %v897_v54  ;;  %v937_v54 = vld [vmem:[%s2783_s7 + $0x70] sm:$0xff] }
  0xff   : > { %1931 = vmatprep.mubr.f32.mxu1 %v612_v63  ;;  %v1940_v2 = vpop.f32.mrb[2].mxu0 }
 0x100   : > { %1932 = vmatmul.mubr.f32.vlgmr.msra.gmra.mrb[0].mxu1 %v613_v1  ;;  %v852_v3 = vpop.f32.mrb[3].mxu0  ;;  %v858_v4 = vadd.f32 %v1940_v2, %v774_v0 }
 0x101   : > { %v853_v5 = vadd.f32 %v852_v3, %v774_v0  ;;  %1973 = vmatprep.mubr.f32.mxu1 %v2497_v58 }
 0x102   : > { %v865_v7 = vsel %vm861_vm4, %v858_v4, 0.0 }
 0x103   : > { %v862_v6 = vsel %vm861_vm4, %v853_v5, 0.0 }
 0x104   : > { %863 = vadd.xlane.f32.xlu0 %v862_v6 }
 0x108   : > { %866 = vadd.xlane.f32.xlu0 %v865_v7 }
 0x191   : > { %v864_v8 = vpop.xlane.xlu0 %863 }
 0x192   : > { %v869_v9 = vmul.f32 0.0625, %v864_v8 }
 0x194   : > { %v871_v10 = vsub.f32 %v853_v5, %v869_v9 }
 0x195   : > { %v867_v29 = vpop.xlane.xlu0 %866 }
 0x196   : > { %v873_v11 = vmul.f32 %v871_v10, %v871_v10  ;;  %v870_v32 = vmul.f32 0.0625, %v867_v29 }
 0x198   : > { %v875_v12 = vsel %vm861_vm4, %v873_v11, 0.0  ;;  %v2521_v38 = vsub.f32 %v858_v4, %v870_v32 }
 0x199   : > { %876 = vadd.xlane.f32.xlu0 %v875_v12  ;;  %v924_v12 = vld [vmem:[%s2783_s7 + $0x8] sm:$0xff] }
 0x19a   : > { %v874_v42 = vmul.f32 %v2521_v38, %v2521_v38 }
 0x19c   : > { %v878_v43 = vsel %vm861_vm4, %v874_v42, 0.0 }
 0x1d3   : > { %v1933_v15 = vpop.f32.mrb[0].mxu1 }
 0x1d4   : > { %v706_v16 = vadd.f32 %v1933_v15, %v633_v14  ;;  %v700_v17 = vpop.f32.mrb[1].mxu1 }
 0x1d5   : > { %v701_v18 = vadd.f32 %v700_v17, %v633_v14  ;;  %v925_v14 = vld [vmem:[%s2783_s7 + $0x10] sm:$0xff] }
 0x1d6   : > { %v712_v19 = vmul.f32 0.044715, %v706_v16  ;;  %v710_v37 = vmul.f32 0.5, %v706_v16 }
 0x1d7   : > { %v711_v20 = vmul.f32 0.044715, %v701_v18  ;;  %v709_v33 = vmul.f32 0.5, %v701_v18 }
 0x1d8   : > { %v714_v21 = vmul.f32 %v712_v19, %v706_v16  ;;  %v928_v19 = vld [vmem:[%s2783_s7 + $0x28] sm:$0xff] }
 0x1d9   : > { %v713_v22 = vmul.f32 %v711_v20, %v701_v18 }
 0x1da   : > { %v716_v23 = vmul.f32 %v714_v21, %v706_v16  ;;  %v929_v21 = vld [vmem:[%s2783_s7 + $0x30] sm:$0xff] }
 0x1db   : > { %v715_v24 = vmul.f32 %v713_v22, %v701_v18  ;;  %v930_v22 = vld [vmem:[%s2783_s7 + $0x38] sm:$0xff] }
 0x1dc   : > { %v718_v25 = vadd.f32 %v716_v23, %v706_v16  ;;  %v926_v16 = vld [vmem:[%s2783_s7 + $0x18] sm:$0xff]  ;;  %v2140_v23 = vpack.c.bf16 %v930_v22, %v929_v21  ;;  %v1250_v22 = vld [vmem:[%s2785_s9 + $0x30] sm:$0xff] }
 0x1dd   : > { %v717_v26 = vadd.f32 %v715_v24, %v701_v18  ;;  %v2132_v17 = vpack.c.bf16 %v926_v16, %v925_v14  ;;  %v927_v18 = vld [vmem:[%s2783_s7 + $0x20] sm:$0xff]  ;;  %v1247_v14 = vld [vmem:[%s2785_s9 + $0x18] sm:$0xff] }
 0x1de   : > { %v720_v27 = vmul.f32 0.7978846, %v718_v25  ;;  %v2136_v20 = vpack.c.bf16 %v928_v19, %v927_v18  ;;  %v1248_v19 = vld [vmem:[%s2785_s9 + $0x20] sm:$0xff] }
 0x1df   : > { %v719_v28 = vmul.f32 0.7978846, %v717_v26 }
 0x1e0   : > { %2237 = vtanh.f32 %v720_v27 }
 0x1e1   : > { %2239 = vtanh.f32 %v719_v28 }
 0x1ea   : > { %v2238_v30 = vpop.eup %2237 }
 0x1eb   : > { %v2240_v31 = vpop.eup %2239  ;;  %v724_v35 = vadd.f32 1.0, %v2238_v30 }
 0x1ec   : > { %v723_v34 = vadd.f32 1.0, %v2240_v31 }
 0x1ed   : > { %v2525_v40 = vmul.f32 %v724_v35, %v710_v37  ;;  %v931_v37 = vld [vmem:[%s2783_s7 + $0x40] sm:$0xff] }
 0x1ee   : > { %v2519_v36 = vmul.f32 %v723_v34, %v709_v33 }
 0x1ef   : > { %v731_v41 = vsel %vm727_vm5, %v2525_v40, 0.0 }
 0x1f0   : > { %v728_v39 = vsel %vm727_vm5, %v2519_v36, 0.0 }
 0x1f1   : > { %729 = vadd.xlane.f32.xlu1 %v728_v39  ;;  %v932_v39 = vld [vmem:[%s2783_s7 + $0x48] sm:$0xff] }
 0x1f5   : > { %732 = vadd.xlane.f32.xlu1 %v731_v41 }
 0x1f9   : > { %879 = vadd.xlane.f32.xlu1 %v878_v43  ;;  %v933_v43 = vld [vmem:[%s2783_s7 + $0x50] sm:$0xff] }
 0x1fa   : > { %v2148_v46 = vpack.c.bf16 %v934_v44, %v933_v43  ;;  %v757_v44 = vsub.s32 1, %v2489_v56 }
 0x226   : > { %v877_v50 = vpop.xlane.xlu0 %876 }
 0x227   : > { %v881_v51 = vmul.f32 0.0625, %v877_v50 }
 0x229   : > { %v883_v52 = vadd.f32 1e-05, %v881_v51 }
 0x22b   : > { %2241 = vrsqrt.f32 %v883_v52 }
 0x235   : > { %v2242_v61 = vpop.eup %2241 }
 0x236   : > { %v887_v63 = vmul.f32 %v2242_v61, %v871_v10  ;;  %v923_v10 = vld [vmem:[%s2783_s7] sm:$0xff] }
 0x237   : > { %v2128_v15 = vpack.c.bf16 %v924_v12, %v923_v10  ;;  %v1246_v12 = vld [vmem:[%s2785_s9 + $0x10] sm:$0xff] }
 0x238   : > { %v893_v0 = vmul.f32 %v892_v55, %v887_v63  ;;  %v2180_v18 = vpack.c.bf16 %v1247_v14, %v1246_v12 }
 0x239   : > { %2129 = vmatprep.subr.bf16.mxu1 %v2128_v15 }
 0x23a   : > { %v899_v1 = vadd.f32 %v898_v62, %v893_v0  ;;  %2131 = vmatpush3.bf16.msra.mxu1 %v2128_v15  ;;  %v919_v0 = vld [vmem:[%s2782_s6] sm:$0xff] }
 0x23b   : > { %2133 = vmatprep.subr.bf16.mxu1 %v2132_v17 }
 0x23c   : > { %v903_v2 = vmul.f32 0.044715, %v899_v1  ;;  %v901_v8 = vmul.f32 0.5, %v899_v1 }
 0x23e   : > { %v905_v3 = vmul.f32 %v903_v2, %v899_v1  ;;  %2135 = vmatpush3.bf16.msra.mxu1 %v2132_v17 }
 0x23f   : > { %2137 = vmatprep.subr.bf16.mxu1 %v2136_v20 }
 0x240   : > { %v907_v4 = vmul.f32 %v905_v3, %v899_v1 }
 0x242   : > { %v909_v5 = vadd.f32 %v907_v4, %v899_v1  ;;  %2139 = vmatpush3.bf16.msra.mxu1 %v2136_v20  ;;  %v920_v1 = vld [vmem:[%s2782_s6 + $0x8] sm:$0xff]  ;;  %v921_v4 = vld [vmem:[%s2782_s6 + $0x10] sm:$0xff] }
 0x243   : > { %2141 = vmatprep.subr.bf16.mxu1 %v2140_v23  ;;  %v2160_v3 = vpack.c.bf16 %v920_v1, %v919_v0  ;;  %v1249_v20 = vld [vmem:[%s2785_s9 + $0x28] sm:$0xff] }
 0x244   : > { %v911_v6 = vmul.f32 0.7978846, %v909_v5  ;;  %v922_v5 = vld [vmem:[%s2782_s6 + $0x18] sm:$0xff]  ;;  %v2184_v21 = vpack.c.bf16 %v1249_v20, %v1248_v19 }
 0x246   : > { %2243 = vtanh.f32 %v911_v6  ;;  %2143 = vmatpush3.bf16.msra.mxu1 %v2140_v23  ;;  %v2164_v6 = vpack.c.bf16 %v922_v5, %v921_v4  ;;  %v1251_v23 = vld [vmem:[%s2785_s9 + $0x38] sm:$0xff] }
 0x250   : > { %v2244_v7 = vpop.eup %2243 }
 0x251   : > { %v915_v9 = vadd.f32 1.0, %v2244_v7  ;;  %v1095_v7 = vld [vmem:[%s2784_s8] sm:$0xff] }
 0x253   : > { %v2553_v11 = vmul.f32 %v915_v9, %v901_v8  ;;  %v1096_v8 = vld [vmem:[%s2784_s8 + $0x8] sm:$0xff] }
 0x254   : > { %v2637_v9 = vpack.c.bf16 %v1096_v8, %v1095_v7 }
 0x255   : > { %1998 = vmatprep.mubr.msk.f32.mxu0 %vm861_vm4, %v2553_v11 }
 0x27e   : > { %v730_v24 = vpop.xlane.xlu1 %729 }
 0x27f   : > { %v735_v25 = vmul.f32 0.03125, %v730_v24  ;;  %v2188_v24 = vpack.c.bf16 %v1251_v23, %v1250_v22  ;;  %v1481_v22 = vld [vmem:[%s2788_s12] sm:$0xff]  ;;  %v1482_v23 = vld [vmem:[%s2788_s12 + $0x8] sm:$0xff] }
 0x281   : > { %v2582_v26 = vsub.f32 %v2519_v36, %v735_v25  ;;  %v1252_v25 = vld [vmem:[%s2785_s9 + $0x40] sm:$0xff] }
 0x282   : > { %v733_v27 = vpop.xlane.xlu1 %732 }
 0x283   : > { %v736_v28 = vmul.f32 0.03125, %v733_v27  ;;  %v739_v29 = vmul.f32 %v2582_v26, %v2582_v26  ;;  %v1254_v27 = vld [vmem:[%s2785_s9 + $0x50] sm:$0xff] }
 0x285   : > { %v2587_v30 = vsub.f32 %v2525_v40, %v736_v28  ;;  %v741_v31 = vsel %vm727_vm5, %v739_v29, 0.0  ;;  %v2144_v40 = vpack.c.bf16 %v932_v39, %v931_v37  ;;  %v1255_v28 = vld [vmem:[%s2785_s9 + $0x58] sm:$0xff] }
 0x286   : > { %742 = vadd.xlane.f32.xlu0 %v741_v31  ;;  %v880_v32 = vpop.xlane.xlu1 %879  ;;  %v2196_v29 = vpack.c.bf16 %v1255_v28, %v1254_v27  ;;  %v1256_v31 = vld [vmem:[%s2785_s9 + $0x60] sm:$0xff] }
 0x287   : > { %v882_v33 = vmul.f32 0.0625, %v880_v32  ;;  %v740_v34 = vmul.f32 %v2587_v30, %v2587_v30  ;;  %2145 = vmatprep.subr.bf16.mxu1 %v2144_v40  ;;  %v1257_v32 = vld [vmem:[%s2785_s9 + $0x68] sm:$0xff] }
 0x288   : > { %2147 = vmatpush3.bf16.msra.mxu1 %v2144_v40 }
 0x289   : > { %v884_v35 = vadd.f32 1e-05, %v882_v33  ;;  %v744_v36 = vsel %vm727_vm5, %v740_v34, 0.0  ;;  %2149 = vmatprep.subr.bf16.mxu1 %v2148_v46  ;;  %v2200_v33 = vpack.c.bf16 %v1257_v32, %v1256_v31  ;;  %v1258_v34 = vld [vmem:[%s2785_s9 + $0x70] sm:$0xff] }
 0x28a   : > { %745 = vadd.xlane.f32.xlu1 %v744_v36 }
 0x28b   : > { %2245 = vrsqrt.f32 %v884_v35  ;;  %v1259_v35 = vld [vmem:[%s2785_s9 + $0x78] sm:$0xff] }
 0x28c   : > { %2151 = vmatpush3.bf16.msra.mxu1 %v2148_v46  ;;  %v2204_v36 = vpack.c.bf16 %v1259_v35, %v1258_v34  ;;  %v758_v46 = vrot.slane %v2502_v59, %v757_v44 }
 0x295   : > { %v2246_v41 = vpop.eup %2245 }
 0x296   : > { %v888_v42 = vmul.f32 %v2246_v41, %v2521_v38  ;;  %v936_v38 = vld [vmem:[%s2783_s7 + $0x68] sm:$0xff] }
 0x297   : > { %v2152_v51 = vpack.c.bf16 %v936_v38, %v935_v48 }
 0x298   : > { %v894_v45 = vmul.f32 %v892_v55, %v888_v42  ;;  %v938_v55 = vld [vmem:[%s2783_s7 + $0x78] sm:$0xff] }
 0x299   : > { %2153 = vmatprep.subr.bf16.mxu1 %v2152_v51 }
 0x29a   : > { %v900_v47 = vadd.f32 %v898_v62, %v894_v45  ;;  %2155 = vmatpush3.bf16.msra.mxu1 %v2152_v51  ;;  %v2156_v62 = vpack.c.bf16 %v938_v55, %v937_v54  ;;  %v763_v45 = vsub.s32 2, %v2489_v56 }
 0x29c   : > { %v904_v50 = vmul.f32 0.044715, %v900_v47  ;;  %2157 = vmatprep.subr.bf16.mxu1 %v2156_v62  ;;  %v902_v15 = vmul.f32 0.5, %v900_v47 }
 0x29e   : > { %v906_v52 = vmul.f32 %v904_v50, %v900_v47  ;;  %2159 = vmatpush3.bf16.msra.mxu1 %v2156_v62 }
 0x29f   : > { %2161 = vmatprep.subr.bf16.mxu1 %v2160_v3 }
 0x2a0   : > { %v908_v61 = vmul.f32 %v906_v52, %v900_v47 }
 0x2a1   : > { %1974 = vmatmul.mubr.f32.vlgmr.msra.gmra.mrb[2].mxu1 %v2504_v60 }
 0x2a2   : > { %v910_v63 = vadd.f32 %v908_v61, %v900_v47  ;;  %2163 = vmatpush3.bf16.msra.mxu1 %v2160_v3 }
 0x2a3   : > { %2165 = vmatprep.subr.bf16.mxu1 %v2164_v6 }
 0x2a4   : > { %v912_v2 = vmul.f32 0.7978846, %v910_v63 }
 0x2a6   : > { %2247 = vtanh.f32 %v912_v2  ;;  %2167 = vmatpush3.bf16.msra.mxu1 %v2164_v6 }
 0x2a7   : > { %2169 = vmatprep.subr.bf16.mxu1 %v2637_v9 }
 0x2b0   : > { %v2248_v10 = vpop.eup %2247 }
 0x2b1   : > { %v916_v16 = vadd.f32 1.0, %v2248_v10 }
 0x2b3   : > { %v918_v17 = vmul.f32 %v916_v16, %v902_v15 }
 0x2b5   : > { %1999 = vmatmul.mubr.msk.f32.vlgmr.msra.gmra.mrb[4].mxu0 %vm861_vm4, %v918_v17 }
 0x2b6   : > { %2179 = vmatpush3.bf16.msra.mxu0 %v2544_v49  ;;  %2033 = vmatprep.mubr.f32.mxu0 %v2497_v58  ;;  %v1253_v58 = vld [vmem:[%s2785_s9 + $0x48] sm:$0xff] }
 0x2b7   : > { %2181 = vmatprep.subr.bf16.mxu0 %v2180_v18  ;;  %v2192_v49 = vpack.c.bf16 %v1253_v58, %v1252_v25  ;;  %v1483_v25 = vld [vmem:[%s2788_s12 + $0x10] sm:$0xff] }
 0x2ba   : > { %2183 = vmatpush3.bf16.msra.mxu0 %v2180_v18 }
 0x2bb   : > { %2185 = vmatprep.subr.bf16.mxu0 %v2184_v21 }
 0x2be   : > { %2187 = vmatpush3.bf16.msra.mxu0 %v2184_v21 }
 0x2bf   : > { %2189 = vmatprep.subr.bf16.mxu0 %v2188_v24 }
 0x2c2   : > { %2191 = vmatpush3.bf16.msra.mxu0 %v2188_v24  ;;  %v2208_v24 = vpack.c.bf16 %v1482_v23, %v1481_v22 }
 0x2c3   : > { %2193 = vmatprep.subr.bf16.mxu0 %v2192_v49 }
 0x2c6   : > { %2195 = vmatpush3.bf16.msra.mxu0 %v2192_v49 }
 0x2c7   : > { %2197 = vmatprep.subr.bf16.mxu0 %v2196_v29 }
 0x2ca   : > { %2199 = vmatpush3.bf16.msra.mxu0 %v2196_v29 }
 0x2cb   : > { %2201 = vmatprep.subr.bf16.mxu0 %v2200_v33 }
 0x2ce   : > { %2203 = vmatpush3.bf16.msra.mxu0 %v2200_v33 }
 0x2cf   : > { %2205 = vmatprep.subr.bf16.mxu0 %v2204_v36 }
 0x2d2   : > { %2207 = vmatpush3.bf16.msra.mxu0 %v2204_v36  ;;  %v1476_v36 = vld [vmem:[%s2787_s11] sm:$0xff] }
 0x2d5   : > { %2034 = vmatmul.mubr.f32.vlgmr.msra.gmra.mrb[4].mxu0 %v2504_v60  ;;  %v764_v60 = vrot.slane %v2502_v59, %v763_v45 }
 0x313   : > { %v743_v37 = vpop.xlane.xlu0 %742 }
 0x314   : > { %v747_v39 = vmul.f32 0.03125, %v743_v37  ;;  %v1477_v37 = vld [vmem:[%s2787_s11 + $0x8] sm:$0xff] }
 0x316   : > { %v749_v40 = vadd.f32 1e-05, %v747_v39  ;;  %v1478_v39 = vld [vmem:[%s2787_s11 + $0x10] sm:$0xff] }
 0x317   : > { %v746_v41 = vpop.xlane.xlu1 %745 }
 0x318   : > { %2249 = vrsqrt.f32 %v749_v40  ;;  %v748_v42 = vmul.f32 0.03125, %v746_v41  ;;  %v2212_v40 = vpack.c.bf16 %v1477_v37, %v1476_v36  ;;  %v1479_v41 = vld [vmem:[%s2787_s11 + $0x18] sm:$0xff] }
 0x31a   : > { %v750_v43 = vadd.f32 1e-05, %v748_v42  ;;  %v2216_v42 = vpack.c.bf16 %v1479_v41, %v1478_v39  ;;  %2213 = vmatprep.subr.bf16.mxu0 %v2212_v40 }
 0x31b   : > { %2215 = vmatpush3.bf16.msra.mxu0 %v2212_v40 }
 0x31c   : > { %2251 = vrsqrt.f32 %v750_v43  ;;  %2217 = vmatprep.subr.bf16.mxu0 %v2216_v42 }
 0x31f   : > { %2219 = vmatpush3.bf16.msra.mxu0 %v2216_v42 }
 0x322   : > { %v2250_v47 = vpop.eup %2249 }
 0x323   : > { %v753_v48 = vmul.f32 %v2250_v47, %v2582_v26  ;;  %v2703_v26 = vld [vmem:[%s2789_s13 + $0x8] sm:$0xff] }
 0x325   : > { %v759_v38 = vmul.f32 %v758_v46, %v753_v48 }
 0x326   : > { %v2252_v50 = vpop.eup %2251 }
 0x327   : > { %v754_v51 = vmul.f32 %v2252_v50, %v2587_v30  ;;  %v765_v52 = vadd.f32 %v764_v60, %v759_v38  ;;  %v1415_v30 = vrot.slane %v2703_v26, %v757_v44  ;;  %v1449_v38 = vrot.slane %v2703_v26, %v763_v45 }
 0x329   : > { %v760_v54 = vmul.f32 %v758_v46, %v754_v51  ;;  %1984 = vmatprep.mubr.msk.f32.mxu1 %vm727_vm5, %v765_v52  ;;  %v1480_v51 = vld [vmem:[%s2787_s11 + $0x20] sm:$0xff]  ;;  %v1455_v52 = vrot.slane %v2703_v26, %v773_v57 }
 0x32a   : > { %2053 = vmatprep.subr.mxu0 %v1480_v51 }
 0x32b   : > { %v766_v55 = vadd.f32 %v764_v60, %v760_v54  ;;  %2054 = vmatpush3.msra.mxu0 %v1480_v51 }
 0x32d   : > { %1985 = vmatmul.mubr.msk.f32.vlgmr.msra.gmra.mrb[2].mxu1 %vm727_vm5, %v766_v55 }
 0x32e   : > { %2171 = vmatpush3.bf16.msra.mxu1 %v2637_v9  ;;  %1991 = vmatprep.mubr.msk.f32.mxu1 %vm861_vm4, %v2553_v11  ;;  %v1182_v11 = vsub.s32 6, %v2489_v56 }
 0x32f   : > { %2209 = vmatprep.subr.bf16.mxu1 %v2208_v24 }
 0x330   : > { %v1183_v3 = vrot.slane %v2502_v59, %v1182_v11 }
 0x335   : > { %1992 = vmatmul.mubr.msk.f32.vlgmr.msra.gmra.mrb[2].mxu1 %vm861_vm4, %v918_v17 }
 0x336   : > { %2211 = vmatpush3.bf16.msra.mxu1 %v2208_v24  ;;  %v1216_v24 = vsub.s32 7, %v2489_v56 }
 0x337   : > { %2040 = vmatprep.subr.mxu1 %v1483_v25 }
 0x33a   : > { %2041 = vmatpush3.msra.mxu1 %v1483_v25  ;;  %v1217_v25 = vrot.slane %v2502_v59, %v1216_v24 }
 0x3a8   : > { %v2035_v61 = vpop.f32.mrb[4].mxu0 }
 0x3a9   : > { %v1403_v62 = vpop.f32.mrb[5].mxu0  ;;  %v1417_v0 = vadd.f32 %v2035_v61, %v1415_v30 }
 0x3aa   : > { %v1416_v63 = vadd.f32 %v1415_v30, %v1403_v62 }
 0x3ab   : > { %v1422_v2 = vsel %vm1418_vm6, %v1417_v0, 0.0 }
 0x3ac   : > { %v1419_v1 = vsel %vm1418_vm6, %v1416_v63, 0.0 }
 0x3ad   : > { %1420 = vadd.xlane.f32.xlu1 %v1419_v1 }
 0x3b1   : > { %1423 = vadd.xlane.f32.xlu1 %v1422_v2 }
 0x408   : > { %v1993_v4 = vpop.f32.mrb[2].mxu1 }
 0x409   : > { %v1169_v5 = vpop.f32.mrb[3].mxu1  ;;  %v1185_v7 = vadd.f32 %v1993_v4, %v1183_v3 }
 0x40a   : > { %v1184_v6 = vadd.f32 %v1183_v3, %v1169_v5 }
 0x40b   : > { %v1190_v9 = vsel %vm1186_vm7, %v1185_v7, 0.0 }
 0x40c   : > { %v1187_v8 = vsel %vm1186_vm7, %v1184_v6, 0.0 }
 0x40d   : > { %1188 = vadd.xlane.f32.xlu0 %v1187_v8 }
 0x411   : > { %1191 = vadd.xlane.f32.xlu0 %v1190_v9 }
 0x43a   : > { %v1421_v10 = vpop.xlane.xlu1 %1420 }
 0x43b   : > { %v1426_v12 = vmul.f32 0.041666668, %v1421_v10 }
 0x43d   : > { %v1428_v14 = vsub.f32 %v1416_v63, %v1426_v12 }
 0x43e   : > { %v1424_v15 = vpop.xlane.xlu1 %1423 }
 0x43f   : > { %v1427_v16 = vmul.f32 0.041666668, %v1424_v15  ;;  %v1430_v17 = vmul.f32 %v1428_v14, %v1428_v14 }
 0x441   : > { %v1429_v18 = vsub.f32 %v1417_v0, %v1427_v16  ;;  %v1432_v19 = vsel %vm1418_vm6, %v1430_v17, 0.0 }
 0x442   : > { %1433 = vadd.xlane.f32.xlu1 %v1432_v19 }
 0x443   : > { %v1431_v20 = vmul.f32 %v1429_v18, %v1429_v18 }
 0x445   : > { %v1435_v21 = vsel %vm1418_vm6, %v1431_v20, 0.0 }
 0x446   : > { %1436 = vadd.xlane.f32.xlu1 %v1435_v21 }
 0x49a   : > { %v1189_v58 = vpop.xlane.xlu0 %1188 }
 0x49b   : > { %v1194_v49 = vmul.f32 0.025, %v1189_v58 }
 0x49d   : > { %v2723_v27 = vsub.f32 %v1184_v6, %v1194_v49  ;;  %v1223_v49 = vrot.slane %v2703_v26, %v632_v13 }
 0x49e   : > { %v1192_v28 = vpop.xlane.xlu0 %1191 }
 0x49f   : > { %v1195_v29 = vmul.f32 0.025, %v1192_v28  ;;  %v1198_v31 = vmul.f32 %v2723_v27, %v2723_v27 }
 0x4a1   : > { %v2727_v32 = vsub.f32 %v1185_v7, %v1195_v29  ;;  %v1200_v33 = vsel %vm1186_vm7, %v1198_v31, 0.0 }
 0x4a2   : > { %1201 = vadd.xlane.f32.xlu0 %v1200_v33 }
 0x4a3   : > { %v1199_v34 = vmul.f32 %v2727_v32, %v2727_v32 }
 0x4a5   : > { %v1203_v35 = vsel %vm1186_vm7, %v1199_v34, 0.0 }
 0x4a6   : > { %1204 = vadd.xlane.f32.xlu0 %v1203_v35 }
 0x4cf   : > { %v1434_v43 = vpop.xlane.xlu1 %1433 }
 0x4d0   : > { %v1438_v44 = vmul.f32 0.041666668, %v1434_v43 }
 0x4d2   : > { %v1440_v46 = vadd.f32 1e-05, %v1438_v44 }
 0x4d3   : > { %v1437_v47 = vpop.xlane.xlu1 %1436 }
 0x4d4   : > { %2253 = vrsqrt.f32 %v1440_v46  ;;  %v1439_v48 = vmul.f32 0.041666668, %v1437_v47 }
 0x4d6   : > { %v1441_v60 = vadd.f32 1e-05, %v1439_v48 }
 0x4d8   : > { %2255 = vrsqrt.f32 %v1441_v60 }
 0x4de   : > { %v2254_v50 = vpop.eup %2253 }
 0x4df   : > { %v1444_v54 = vmul.f32 %v2254_v50, %v1428_v14 }
 0x4e1   : > { %v1450_v55 = vmul.f32 %v1449_v38, %v1444_v54 }
 0x4e2   : > { %v2256_v30 = vpop.eup %2255 }
 0x4e3   : > { %v1456_v61 = vadd.f32 %v1455_v52, %v1450_v55  ;;  %v1445_v62 = vmul.f32 %v2256_v30, %v1429_v18  ;;  %v1649_v30 = vrot.slane %v2703_v26, %v891_v53 }
 0x4e5   : > { %v1451_v63 = vmul.f32 %v1449_v38, %v1445_v62  ;;  %v1460_v0 = vmul.f32 0.044715, %v1456_v61  ;;  %v1458_v9 = vmul.f32 0.5, %v1456_v61 }
 0x4e7   : > { %v1457_v1 = vadd.f32 %v1455_v52, %v1451_v63  ;;  %v1462_v45 = vmul.f32 %v1460_v0, %v1456_v61 }
 0x4e9   : > { %v1464_v2 = vmul.f32 %v1462_v45, %v1456_v61  ;;  %v1461_v11 = vmul.f32 0.044715, %v1457_v1  ;;  %v1459_v15 = vmul.f32 0.5, %v1457_v1 }
 0x4eb   : > { %v1466_v3 = vadd.f32 %v1464_v2, %v1456_v61  ;;  %v1463_v4 = vmul.f32 %v1461_v11, %v1457_v1 }
 0x4ed   : > { %v1468_v5 = vmul.f32 0.7978846, %v1466_v3  ;;  %v1465_v6 = vmul.f32 %v1463_v4, %v1457_v1 }
 0x4ef   : > { %2257 = vtanh.f32 %v1468_v5  ;;  %v1467_v7 = vadd.f32 %v1465_v6, %v1457_v1 }
 0x4f1   : > { %v1469_v57 = vmul.f32 0.7978846, %v1467_v7 }
 0x4f3   : > { %2259 = vtanh.f32 %v1469_v57 }
 0x4f9   : > { %v2258_v8 = vpop.eup %2257 }
 0x4fa   : > { %v1472_v10 = vadd.f32 1.0, %v2258_v8 }
 0x4fc   : > { %v1474_v12 = vmul.f32 %v1472_v10, %v1458_v9 }
 0x4fd   : > { %v2260_v14 = vpop.eup %2259 }
 0x4fe   : > { %2042 = vmatprep.mubr.msk.f32.mxu1 %vm1418_vm6, %v1474_v12  ;;  %v1473_v16 = vadd.f32 1.0, %v2260_v14 }
 0x500   : > { %v1475_v17 = vmul.f32 %v1473_v16, %v1459_v15 }
 0x502   : > { %2043 = vmatmul.mubr.msk.f32.vlgmr.msra.gmra.mrb[4].mxu1 %vm1418_vm6, %v1475_v17 }
 0x52f   : > { %v1202_v18 = vpop.xlane.xlu0 %1201 }
 0x530   : > { %v1206_v19 = vmul.f32 0.025, %v1202_v18 }
 0x532   : > { %v1208_v20 = vadd.f32 1e-05, %v1206_v19 }
 0x533   : > { %v1205_v21 = vpop.xlane.xlu0 %1204 }
 0x534   : > { %2261 = vrsqrt.f32 %v1208_v20  ;;  %v1207_v22 = vmul.f32 0.025, %v1205_v21 }
 0x536   : > { %v1209_v23 = vadd.f32 1e-05, %v1207_v22 }
 0x538   : > { %2263 = vrsqrt.f32 %v1209_v23 }
 0x53e   : > { %v2262_v58 = vpop.eup %2261 }
 0x53f   : > { %v1212_v28 = vmul.f32 %v2262_v58, %v2723_v27 }
 0x541   : > { %v1218_v29 = vmul.f32 %v1217_v25, %v1212_v28 }
 0x542   : > { %v2264_v31 = vpop.eup %2263 }
 0x543   : > { %v1224_v33 = vadd.f32 %v1223_v49, %v1218_v29  ;;  %v1213_v34 = vmul.f32 %v2264_v31, %v2727_v32 }
 0x545   : > { %v1219_v35 = vmul.f32 %v1217_v25, %v1213_v34  ;;  %v1228_v36 = vmul.f32 0.044715, %v1224_v33  ;;  %v1226_v47 = vmul.f32 0.5, %v1224_v33 }
 0x547   : > { %v1225_v37 = vadd.f32 %v1223_v49, %v1219_v35  ;;  %v1230_v39 = vmul.f32 %v1228_v36, %v1224_v33 }
 0x549   : > { %v1232_v40 = vmul.f32 %v1230_v39, %v1224_v33  ;;  %v1229_v41 = vmul.f32 0.044715, %v1225_v37  ;;  %v1227_v38 = vmul.f32 0.5, %v1225_v37 }
 0x54b   : > { %v1234_v42 = vadd.f32 %v1232_v40, %v1224_v33  ;;  %v1231_v59 = vmul.f32 %v1229_v41, %v1225_v37 }
 0x54d   : > { %v1236_v43 = vmul.f32 0.7978846, %v1234_v42  ;;  %v1233_v44 = vmul.f32 %v1231_v59, %v1225_v37 }
 0x54f   : > { %2265 = vtanh.f32 %v1236_v43  ;;  %v1235_v46 = vadd.f32 %v1233_v44, %v1225_v37 }
 0x551   : > { %v1237_v13 = vmul.f32 0.7978846, %v1235_v46 }
 0x553   : > { %2267 = vtanh.f32 %v1237_v13 }
 0x559   : > { %v2266_v27 = vpop.eup %2265 }
 0x55a   : > { %v1240_v48 = vadd.f32 1.0, %v2266_v27 }
 0x55c   : > { %v1242_v60 = vmul.f32 %v1240_v48, %v1226_v47 }
 0x55d   : > { %v2268_v32 = vpop.eup %2267 }
 0x55e   : > { %2055 = vmatprep.mubr.msk.f32.mxu0 %vm1186_vm7, %v1242_v60  ;;  %v1241_v50 = vadd.f32 1.0, %v2268_v32 }
 0x560   : > { %v1243_v51 = vmul.f32 %v1241_v50, %v1227_v38 }
 0x562   : > { %2056 = vmatmul.mubr.msk.f32.vlgmr.msra.gmra.mrb[6].mxu0 %vm1186_vm7, %v1243_v51 }
 0x5d5   : > { %v2044_v52 = vpop.f32.mrb[4].mxu1 }
 0x5d6   : > { %v1556_v54 = vpop.f32.mrb[5].mxu1 }
 0x635   : > { %v2057_v55 = vpop.f32.mrb[6].mxu0 }
 0x636   : > { %v1643_v61 = vadd.f32 %v2057_v55, %v2044_v52  ;;  %v1637_v62 = vpop.f32.mrb[7].mxu0 }
 0x637   : > { %v1638_v63 = vadd.f32 %v1637_v62, %v1556_v54 }
 0x638   : > { %v1651_v1 = vadd.f32 %v1649_v30, %v1643_v61 }
 0x639   : > { %v1650_v0 = vadd.f32 %v1649_v30, %v1638_v63 }
 0x63a   : > { %1653 = vst [vmem:[%s513_s24 + $0x8] sm:$0xff] %v1651_v1 }
 0x63b   : > { %1652 = vst [vmem:[%s513_s24] sm:$0xff] %v1650_v0 }
 0x63c PF: > { %s24_s29 = sadd.s32 1, %s2275_s29  }
 0x63d   : > { %p21_p5 = scmp.ge.s32.totalorder %s24_s29, 4  }
 0x63f   :  { %23 = sbr.rel (!%p21_p5) target bundleno = 1 (0x1), region = 112 }

</bundles_post_ra>
